<compile_context>
chip_gen: v7x
topology: tpu7x:2x2x1
jax: 0.10.0
libtpu: 0.0.40
codegen_flags: <defaults>
</compile_context>

<pallas_src>
import functools
import math

import jax
import jax.numpy as jnp
from jax.experimental import pallas as pl
from jax.experimental.pallas import tpu as pltpu

MATMUL_DTYPE = jnp.bfloat16   # MXU operand dtype (f32 accumulation). Set jnp.float32 to disable.


def _round_up(v, m):
    return (v + m - 1) // m * m


# ----------------------------------------------------------------------------
# Fused kernel (operates on one [TN, C] row tile; C = d_model in lanes)
# ----------------------------------------------------------------------------
def _colwise_attn_kernel(x_ref, gs_ref, ln_g_ref, ln_b_ref,
                         wq_ref, bq_ref, wk_ref, bk_ref,
                         wv_ref, bv_ref, wg_ref, bg_ref,
                         r_ref, wo0_ref, wo1_ref, wo2_ref, bo_ref,
                         o_ref, *, matmul_dtype):
    x = x_ref[...].astype(jnp.float32)                    # [TN, C]
    C = x.shape[-1]
    C3 = C // 3

    # --- LayerNorm (eps matches the PyTorch module: 1e-6) --------------------
    mu = jnp.mean(x, axis=-1, keepdims=True)
    var = jnp.mean(jnp.square(x - mu), axis=-1, keepdims=True)
    xn = (x - mu) * jax.lax.rsqrt(var + 1e-6)
    xn = xn * ln_g_ref[...] + ln_b_ref[...]

    # --- per-segment projections (x.view(B, L, 3, C//3) in the reference) ----
    segs = [xn[:, a * C3:(a + 1) * C3].astype(matmul_dtype) for a in range(3)]

    def proj(w_ref_, b_ref_):
        w = w_ref_[...]
        b = b_ref_[...]
        return [jnp.dot(s, w, preferred_element_type=jnp.float32) + b for s in segs]

    q = proj(wq_ref, bq_ref)        # 3 x [TN, C3]  (lane index = head*dk3 + d)
    k = proj(wk_ref, bk_ref)
    v = proj(wv_ref, bv_ref)
    g = proj(wg_ref, bg_ref)

    # R[c, c'] = 1/sqrt(d_k) if lanes c, c' lie in the same head's dk3 block, else 0.
    # (q_a * k_b) @ R == per-head scaled raw score, broadcast across that head's dk3 lanes,
    # so softmax over the 3 key segments and the weighted-V sum stay purely elementwise.
    R = r_ref[...]                                         # [C3, C3] float32

    outs = []
    for a in range(3):                                     # query segment
        s = [jnp.dot(q[a] * k[b], R, preferred_element_type=jnp.float32)
             for b in range(3)]                            # broadcast scores per key segment
        m = jnp.maximum(jnp.maximum(s[0], s[1]), s[2])
        e = [jnp.exp(sb - m) for sb in s]
        inv = pl.reciprocal(e[0] + e[1] + e[2], approx=True)        # EUP divide
        o = (e[0] * v[0] + e[1] * v[1] + e[2] * v[2]) * inv
        gate = pl.reciprocal(1.0 + jnp.exp(-g[a]), approx=True)     # sigmoid on EUP
        outs.append((o * gate).astype(matmul_dtype))

    # --- output projection + residual * learned scalar gate (dropout = identity) ---
    y = jnp.dot(outs[0], wo0_ref[...], preferred_element_type=jnp.float32)
    y = y + jnp.dot(outs[1], wo1_ref[...], preferred_element_type=jnp.float32)
    y = y + jnp.dot(outs[2], wo2_ref[...], preferred_element_type=jnp.float32)
    y = y + bo_ref[...]
    o_ref[...] = (y + x * gs_ref[0]).astype(o_ref.dtype)


# ----------------------------------------------------------------------------
# Wrapper
# ----------------------------------------------------------------------------
def colwise_gate_self_attention(x, params, h, *, block_rows=128,
                                matmul_dtype=MATMUL_DTYPE):
    B, L, C = x.shape
    assert C % 9 == 0 and C % h == 0, "d_model must be divisible by 9 and by h"
    d_k = C // h
    assert d_k % 3 == 0, "d_k must be divisible by 3 (required by the reference .view)"
    C3 = C // 3
    dk3 = d_k // 3

    N = B * L
    TN = min(_round_up(block_rows, 8), _round_up(N, 8))    # sublane-aligned row tile
    Npad = _round_up(N, TN)

    x2 = x.reshape(N, C)
    if Npad != N:
        x2 = jnp.pad(x2, ((0, Npad - N), (0, 0)))

    # block-ones score-reduction matrix, pre-scaled by 1/sqrt(d_k)
    lane = jnp.arange(C3)
    R = (jnp.equal(lane[:, None] // dk3, lane[None, :] // dk3)
         .astype(jnp.float32)) * (1.0 / math.sqrt(d_k))

    wm = lambda a: a.astype(matmul_dtype)
    row = lambda a: a.reshape(1, -1).astype(jnp.float32)
    wo = params['out_w']

    args = (
        x2,
        params['gate'].astype(jnp.float32).reshape(1),     # learned scalar residual gate
        row(params['ln_g']), row(params['ln_b']),
        wm(params['q_w']), row(params['q_b']),
        wm(params['k_w']), row(params['k_b']),
        wm(params['v_w']), row(params['v_b']),
        wm(params['g_w']), row(params['g_b']),
        R,
        wm(wo[0 * C3:1 * C3, :]), wm(wo[1 * C3:2 * C3, :]), wm(wo[2 * C3:3 * C3, :]),
        row(params['out_b']),
    )

    def _resident(a):
        nd = a.ndim
        return pl.BlockSpec(a.shape, lambda i, _nd=nd: (0,) * _nd)

    in_specs = [pl.BlockSpec((TN, C), lambda i: (i, 0)),               # activation tile
                pl.BlockSpec(memory_space=pltpu.MemorySpace.SMEM)]     # scalar gate in SMEM
    in_specs += [_resident(a) for a in args[2:]]                       # resident weights

    out = pl.pallas_call(
        functools.partial(_colwise_attn_kernel, matmul_dtype=matmul_dtype),
        out_shape=jax.ShapeDtypeStruct((Npad, C), x.dtype),
        grid=(Npad // TN,),
        in_specs=in_specs,
        out_specs=pl.BlockSpec((TN, C), lambda i: (i, 0)),
        compiler_params=pltpu.CompilerParams(
            dimension_semantics=("parallel",),           # shard row tiles across v7x cores
            vmem_limit_bytes=32 * 1024 * 1024),
    )(*args)

    return out[:N].reshape(B, L, C)


# ----------------------------------------------------------------------------
# Pure-JAX reference (mirrors the PyTorch forward; dropout = identity)
# ----------------------------------------------------------------------------
def colwise_reference(x, p, h):
    B, L, C = x.shape
    C3 = C // 3
    d_k = C // h
    dk3 = d_k // 3

    ori = x
    mu = jnp.mean(x, axis=-1, keepdims=True)
    var = jnp.mean(jnp.square(x - mu), axis=-1, keepdims=True)
    xn = (x - mu) / jnp.sqrt(var + 1e-6) * p['ln_g'] + p['ln_b']
    xv = xn.reshape(B, L, 3, C3)

    def proj(w, b):
        t = xv @ w + b                                               # [B, L, 3, C3]
        return t.reshape(B, L, 3, h, dk3).transpose(0, 1, 3, 2, 4)   # [B, L, h, 3, dk3]

    q = proj(p['q_w'], p['q_b'])
    k = proj(p['k_w'], p['k_b'])
    v = proj(p['v_w'], p['v_b'])
    g = proj(p['g_w'], p['g_b'])

    s = jnp.einsum('blhad,blhed->blhae', q, k) / math.sqrt(d_k)
    prob = jax.nn.softmax(s, axis=-1)
    ho = jnp.einsum('blhae,blhed->blhad', prob, v) * jax.nn.sigmoid(g)
    ho = ho.transpose(0, 1, 3, 2, 4).reshape(B, L, C)
    return ho @ p['out_w'] + p['out_b'] + ori * p['gate']


# ----------------------------------------------------------------------------
# Deterministic synthetic parameters (weights stored [in, out]; a real PyTorch
# nn.Linear weight ([out, in]) would be transposed when importing checkpoints)
# ----------------------------------------------------------------------------
def init_colwise_params(key, d_model, h):
    C3 = d_model // 3
    kq, kk, kv, kg, ko, kln = jax.random.split(key, 6)

    def dense(k, din, dout, w_scale=0.05, b_scale=0.01):
        kw, kb = jax.random.split(k)
        return (jax.random.normal(kw, (din, dout), jnp.float32) * w_scale,
                jax.random.normal(kb, (dout,), jnp.float32) * b_scale)

    kg1, kg2 = jax.random.split(kln)
    p = {
        'ln_g': 1.0 + 0.05 * jax.random.normal(kg1, (d_model,), jnp.float32),
        'ln_b': 0.05 * jax.random.normal(kg2, (d_model,), jnp.float32),
        'gate': jnp.ones((), jnp.float32),       # self.g = Parameter(torch.ones(1))
    }
    p['q_w'], p['q_b'] = dense(kq, C3, C3)
    p['k_w'], p['k_b'] = dense(kk, C3, C3)
    p['v_w'], p['v_b'] = dense(kv, C3, C3)
    p['g_w'], p['g_b'] = dense(kg, C3, C3)
    p['out_w'], p['out_b'] = dense(ko, d_model, d_model)
    return p


# ----------------------------------------------------------------------------
# Main
# ----------------------------------------------------------------------------
if __name__ == "__main__":
    B, L, d_model, h = 2, 8, 36, 4       # d_model % 9 == 0, d_model % h == 0, d_k = 9
    key = jax.random.PRNGKey(0)
    kx, kp, kx2 = jax.random.split(key, 3)

    x = jax.random.normal(kx, (B, L, d_model), jnp.float32)
    params = init_colwise_params(kp, d_model, h)

    out = jax.block_until_ready(colwise_gate_self_attention(x, params, h))
    assert out.shape == (B, L, d_model), out.shape
    assert bool(jnp.all(jnp.isfinite(out)))
    ref = colwise_reference(x, params, h)
    err = float(jnp.max(jnp.abs(out - ref)))
    assert err < 3e-2, f"mismatch vs reference: max abs err = {err}"

    # second shape exercises the multi-tile ("parallel") grid path
    x_big = jax.random.normal(kx2, (2, 128, d_model), jnp.float32)
    out_big = jax.block_until_ready(colwise_gate_self_attention(x_big, params, h))
    assert out_big.shape == x_big.shape
    assert bool(jnp.all(jnp.isfinite(out_big)))
    ref_big = colwise_reference(x_big, params, h)
    err_big = float(jnp.max(jnp.abs(out_big - ref_big)))
    assert err_big < 3e-2, f"mismatch vs reference (tiled): max abs err = {err_big}"

    print("KERNEL_OK")
</pallas_src>

<mosaic_0001>
module attributes {stable_mosaic.version = 11 : i64} {
  func.func @_colwise_attn_kernel(%arg0: i32, %arg1: memref<16x36xf32, #tpu.memory_space<vmem>>, %arg2: memref<1xf32, #tpu.memory_space<smem>>, %arg3: memref<1x36xf32, #tpu.memory_space<vmem>>, %arg4: memref<1x36xf32, #tpu.memory_space<vmem>>, %arg5: memref<12x12xbf16, #tpu.memory_space<vmem>>, %arg6: memref<1x12xf32, #tpu.memory_space<vmem>>, %arg7: memref<12x12xbf16, #tpu.memory_space<vmem>>, %arg8: memref<1x12xf32, #tpu.memory_space<vmem>>, %arg9: memref<12x12xbf16, #tpu.memory_space<vmem>>, %arg10: memref<1x12xf32, #tpu.memory_space<vmem>>, %arg11: memref<12x12xbf16, #tpu.memory_space<vmem>>, %arg12: memref<1x12xf32, #tpu.memory_space<vmem>>, %arg13: memref<12x12xf32, #tpu.memory_space<vmem>>, %arg14: memref<12x36xbf16, #tpu.memory_space<vmem>>, %arg15: memref<12x36xbf16, #tpu.memory_space<vmem>>, %arg16: memref<12x36xbf16, #tpu.memory_space<vmem>>, %arg17: memref<1x36xf32, #tpu.memory_space<vmem>>, %arg18: memref<16x36xf32, #tpu.memory_space<vmem>>) attributes {dimension_semantics = [#tpu.dimension_semantics<parallel>], iteration_bounds = array<i64: 1>, scalar_prefetch = 0 : i64, scratch_operands = 0 : i64, tpu.core_type = #tpu.core_type<tc>, window_params = [{transform_indices = @transform_0, window_bounds = array<i64: 16, 36>}, {transform_indices = @transform_1, window_bounds = array<i64: 1>}, {pipeline_mode = #tpu.pipeline_mode<synchronous>, transform_indices = @transform_2, window_bounds = array<i64: 1, 36>}, {pipeline_mode = #tpu.pipeline_mode<synchronous>, transform_indices = @transform_3, window_bounds = array<i64: 1, 36>}, {pipeline_mode = #tpu.pipeline_mode<synchronous>, transform_indices = @transform_4, window_bounds = array<i64: 12, 12>}, {pipeline_mode = #tpu.pipeline_mode<synchronous>, transform_indices = @transform_5, window_bounds = array<i64: 1, 12>}, {pipeline_mode = #tpu.pipeline_mode<synchronous>, transform_indices = @transform_6, window_bounds = array<i64: 12, 12>}, {pipeline_mode = #tpu.pipeline_mode<synchronous>, transform_indices = @transform_7, window_bounds = array<i64: 1, 12>}, {pipeline_mode = #tpu.pipeline_mode<synchronous>, transform_indices = @transform_8, window_bounds = array<i64: 12, 12>}, {pipeline_mode = #tpu.pipeline_mode<synchronous>, transform_indices = @transform_9, window_bounds = array<i64: 1, 12>}, {pipeline_mode = #tpu.pipeline_mode<synchronous>, transform_indices = @transform_10, window_bounds = array<i64: 12, 12>}, {pipeline_mode = #tpu.pipeline_mode<synchronous>, transform_indices = @transform_11, window_bounds = array<i64: 1, 12>}, {pipeline_mode = #tpu.pipeline_mode<synchronous>, transform_indices = @transform_12, window_bounds = array<i64: 12, 12>}, {pipeline_mode = #tpu.pipeline_mode<synchronous>, transform_indices = @transform_13, window_bounds = array<i64: 12, 36>}, {pipeline_mode = #tpu.pipeline_mode<synchronous>, transform_indices = @transform_14, window_bounds = array<i64: 12, 36>}, {pipeline_mode = #tpu.pipeline_mode<synchronous>, transform_indices = @transform_15, window_bounds = array<i64: 12, 36>}, {pipeline_mode = #tpu.pipeline_mode<synchronous>, transform_indices = @transform_16, window_bounds = array<i64: 1, 36>}, {transform_indices = @transform_17, window_bounds = array<i64: 16, 36>}]} {
    %c0 = arith.constant 0 : index
    %c0_0 = arith.constant 0 : index
    %0 = vector.load %arg1[%c0, %c0_0] : memref<16x36xf32, #tpu.memory_space<vmem>>, vector<16x36xf32>
    %cst = arith.constant dense<0.000000e+00> : vector<16xf32>
    %1 = vector.multi_reduction <add>, %0, %cst [1] : vector<16x36xf32> to vector<16xf32>
    %2 = vector.shape_cast %1 : vector<16xf32> to vector<16x1xf32>
    %cst_1 = arith.constant 3.600000e+01 : f32
    %3 = vector.broadcast %cst_1 : f32 to vector<16x1xf32>
    %4 = arith.divf %2, %3 : vector<16x1xf32>
    %5 = vector.broadcast %4 : vector<16x1xf32> to vector<16x36xf32>
    %6 = arith.subf %0, %5 : vector<16x36xf32>
    %7 = arith.mulf %6, %6 : vector<16x36xf32>
    %cst_2 = arith.constant dense<0.000000e+00> : vector<16xf32>
    %8 = vector.multi_reduction <add>, %7, %cst_2 [1] : vector<16x36xf32> to vector<16xf32>
    %9 = vector.shape_cast %8 : vector<16xf32> to vector<16x1xf32>
    %cst_3 = arith.constant 3.600000e+01 : f32
    %10 = vector.broadcast %cst_3 : f32 to vector<16x1xf32>
    %11 = arith.divf %9, %10 : vector<16x1xf32>
    %12 = vector.broadcast %4 : vector<16x1xf32> to vector<16x36xf32>
    %13 = arith.subf %0, %12 : vector<16x36xf32>
    %cst_4 = arith.constant 9.99999997E-7 : f32
    %14 = vector.broadcast %cst_4 : f32 to vector<16x1xf32>
    %15 = arith.addf %11, %14 : vector<16x1xf32>
    %16 = math.rsqrt %15 : vector<16x1xf32>
    %17 = vector.broadcast %16 : vector<16x1xf32> to vector<16x36xf32>
    %18 = arith.mulf %13, %17 : vector<16x36xf32>
    %c0_5 = arith.constant 0 : index
    %c0_6 = arith.constant 0 : index
    %19 = vector.load %arg3[%c0_5, %c0_6] : memref<1x36xf32, #tpu.memory_space<vmem>>, vector<1x36xf32>
    %20 = vector.broadcast %19 : vector<1x36xf32> to vector<16x36xf32>
    %21 = arith.mulf %18, %20 : vector<16x36xf32>
    %c0_7 = arith.constant 0 : index
    %c0_8 = arith.constant 0 : index
    %22 = vector.load %arg4[%c0_7, %c0_8] : memref<1x36xf32, #tpu.memory_space<vmem>>, vector<1x36xf32>
    %23 = vector.broadcast %22 : vector<1x36xf32> to vector<16x36xf32>
    %24 = arith.addf %21, %23 : vector<16x36xf32>
    %25 = vector.extract_strided_slice %24 {offsets = [0, 0], sizes = [16, 12], strides = [1, 1]} : vector<16x36xf32> to vector<16x12xf32>
    %26 = arith.truncf %25 : vector<16x12xf32> to vector<16x12xbf16>
    %27 = vector.extract_strided_slice %24 {offsets = [0, 12], sizes = [16, 12], strides = [1, 1]} : vector<16x36xf32> to vector<16x12xf32>
    %28 = arith.truncf %27 : vector<16x12xf32> to vector<16x12xbf16>
    %29 = vector.extract_strided_slice %24 {offsets = [0, 24], sizes = [16, 12], strides = [1, 1]} : vector<16x36xf32> to vector<16x12xf32>
    %30 = arith.truncf %29 : vector<16x12xf32> to vector<16x12xbf16>
    %c0_9 = arith.constant 0 : index
    %c0_10 = arith.constant 0 : index
    %31 = vector.load %arg5[%c0_9, %c0_10] : memref<12x12xbf16, #tpu.memory_space<vmem>>, vector<12x12xbf16>
    %c0_11 = arith.constant 0 : index
    %c0_12 = arith.constant 0 : index
    %32 = vector.load %arg6[%c0_11, %c0_12] : memref<1x12xf32, #tpu.memory_space<vmem>>, vector<1x12xf32>
    %cst_13 = arith.constant dense<0.000000e+00> : vector<16x12xf32>
    %33 = tpu.matmul %26, %31, %cst_13 {dimension_numbers = #tpu.dot_dimension_numbers<[1], [0], [0], [1], [0, 0, 1, 1], [], []>} : vector<16x12xbf16>, vector<12x12xbf16>, vector<16x12xf32> -> vector<16x12xf32>
    %34 = vector.broadcast %32 : vector<1x12xf32> to vector<16x12xf32>
    %35 = arith.addf %33, %34 : vector<16x12xf32>
    %cst_14 = arith.constant dense<0.000000e+00> : vector<16x12xf32>
    %36 = tpu.matmul %28, %31, %cst_14 {dimension_numbers = #tpu.dot_dimension_numbers<[1], [0], [0], [1], [0, 0, 1, 1], [], []>} : vector<16x12xbf16>, vector<12x12xbf16>, vector<16x12xf32> -> vector<16x12xf32>
    %37 = vector.broadcast %32 : vector<1x12xf32> to vector<16x12xf32>
    %38 = arith.addf %36, %37 : vector<16x12xf32>
    %cst_15 = arith.constant dense<0.000000e+00> : vector<16x12xf32>
    %39 = tpu.matmul %30, %31, %cst_15 {dimension_numbers = #tpu.dot_dimension_numbers<[1], [0], [0], [1], [0, 0, 1, 1], [], []>} : vector<16x12xbf16>, vector<12x12xbf16>, vector<16x12xf32> -> vector<16x12xf32>
    %40 = vector.broadcast %32 : vector<1x12xf32> to vector<16x12xf32>
    %41 = arith.addf %39, %40 : vector<16x12xf32>
    %c0_16 = arith.constant 0 : index
    %c0_17 = arith.constant 0 : index
    %42 = vector.load %arg7[%c0_16, %c0_17] : memref<12x12xbf16, #tpu.memory_space<vmem>>, vector<12x12xbf16>
    %c0_18 = arith.constant 0 : index
    %c0_19 = arith.constant 0 : index
    %43 = vector.load %arg8[%c0_18, %c0_19] : memref<1x12xf32, #tpu.memory_space<vmem>>, vector<1x12xf32>
    %cst_20 = arith.constant dense<0.000000e+00> : vector<16x12xf32>
    %44 = tpu.matmul %26, %42, %cst_20 {dimension_numbers = #tpu.dot_dimension_numbers<[1], [0], [0], [1], [0, 0, 1, 1], [], []>} : vector<16x12xbf16>, vector<12x12xbf16>, vector<16x12xf32> -> vector<16x12xf32>
    %45 = vector.broadcast %43 : vector<1x12xf32> to vector<16x12xf32>
    %46 = arith.addf %44, %45 : vector<16x12xf32>
    %cst_21 = arith.constant dense<0.000000e+00> : vector<16x12xf32>
    %47 = tpu.matmul %28, %42, %cst_21 {dimension_numbers = #tpu.dot_dimension_numbers<[1], [0], [0], [1], [0, 0, 1, 1], [], []>} : vector<16x12xbf16>, vector<12x12xbf16>, vector<16x12xf32> -> vector<16x12xf32>
    %48 = vector.broadcast %43 : vector<1x12xf32> to vector<16x12xf32>
    %49 = arith.addf %47, %48 : vector<16x12xf32>
    %cst_22 = arith.constant dense<0.000000e+00> : vector<16x12xf32>
    %50 = tpu.matmul %30, %42, %cst_22 {dimension_numbers = #tpu.dot_dimension_numbers<[1], [0], [0], [1], [0, 0, 1, 1], [], []>} : vector<16x12xbf16>, vector<12x12xbf16>, vector<16x12xf32> -> vector<16x12xf32>
    %51 = vector.broadcast %43 : vector<1x12xf32> to vector<16x12xf32>
    %52 = arith.addf %50, %51 : vector<16x12xf32>
    %c0_23 = arith.constant 0 : index
    %c0_24 = arith.constant 0 : index
    %53 = vector.load %arg9[%c0_23, %c0_24] : memref<12x12xbf16, #tpu.memory_space<vmem>>, vector<12x12xbf16>
    %c0_25 = arith.constant 0 : index
    %c0_26 = arith.constant 0 : index
    %54 = vector.load %arg10[%c0_25, %c0_26] : memref<1x12xf32, #tpu.memory_space<vmem>>, vector<1x12xf32>
    %cst_27 = arith.constant dense<0.000000e+00> : vector<16x12xf32>
    %55 = tpu.matmul %26, %53, %cst_27 {dimension_numbers = #tpu.dot_dimension_numbers<[1], [0], [0], [1], [0, 0, 1, 1], [], []>} : vector<16x12xbf16>, vector<12x12xbf16>, vector<16x12xf32> -> vector<16x12xf32>
    %56 = vector.broadcast %54 : vector<1x12xf32> to vector<16x12xf32>
    %57 = arith.addf %55, %56 : vector<16x12xf32>
    %cst_28 = arith.constant dense<0.000000e+00> : vector<16x12xf32>
    %58 = tpu.matmul %28, %53, %cst_28 {dimension_numbers = #tpu.dot_dimension_numbers<[1], [0], [0], [1], [0, 0, 1, 1], [], []>} : vector<16x12xbf16>, vector<12x12xbf16>, vector<16x12xf32> -> vector<16x12xf32>
    %59 = vector.broadcast %54 : vector<1x12xf32> to vector<16x12xf32>
    %60 = arith.addf %58, %59 : vector<16x12xf32>
    %cst_29 = arith.constant dense<0.000000e+00> : vector<16x12xf32>
    %61 = tpu.matmul %30, %53, %cst_29 {dimension_numbers = #tpu.dot_dimension_numbers<[1], [0], [0], [1], [0, 0, 1, 1], [], []>} : vector<16x12xbf16>, vector<12x12xbf16>, vector<16x12xf32> -> vector<16x12xf32>
    %62 = vector.broadcast %54 : vector<1x12xf32> to vector<16x12xf32>
    %63 = arith.addf %61, %62 : vector<16x12xf32>
    %c0_30 = arith.constant 0 : index
    %c0_31 = arith.constant 0 : index
    %64 = vector.load %arg11[%c0_30, %c0_31] : memref<12x12xbf16, #tpu.memory_space<vmem>>, vector<12x12xbf16>
    %c0_32 = arith.constant 0 : index
    %c0_33 = arith.constant 0 : index
    %65 = vector.load %arg12[%c0_32, %c0_33] : memref<1x12xf32, #tpu.memory_space<vmem>>, vector<1x12xf32>
    %cst_34 = arith.constant dense<0.000000e+00> : vector<16x12xf32>
    %66 = tpu.matmul %26, %64, %cst_34 {dimension_numbers = #tpu.dot_dimension_numbers<[1], [0], [0], [1], [0, 0, 1, 1], [], []>} : vector<16x12xbf16>, vector<12x12xbf16>, vector<16x12xf32> -> vector<16x12xf32>
    %67 = vector.broadcast %65 : vector<1x12xf32> to vector<16x12xf32>
    %68 = arith.addf %66, %67 : vector<16x12xf32>
    %cst_35 = arith.constant dense<0.000000e+00> : vector<16x12xf32>
    %69 = tpu.matmul %28, %64, %cst_35 {dimension_numbers = #tpu.dot_dimension_numbers<[1], [0], [0], [1], [0, 0, 1, 1], [], []>} : vector<16x12xbf16>, vector<12x12xbf16>, vector<16x12xf32> -> vector<16x12xf32>
    %70 = vector.broadcast %65 : vector<1x12xf32> to vector<16x12xf32>
    %71 = arith.addf %69, %70 : vector<16x12xf32>
    %cst_36 = arith.constant dense<0.000000e+00> : vector<16x12xf32>
    %72 = tpu.matmul %30, %64, %cst_36 {dimension_numbers = #tpu.dot_dimension_numbers<[1], [0], [0], [1], [0, 0, 1, 1], [], []>} : vector<16x12xbf16>, vector<12x12xbf16>, vector<16x12xf32> -> vector<16x12xf32>
    %73 = vector.broadcast %65 : vector<1x12xf32> to vector<16x12xf32>
    %74 = arith.addf %72, %73 : vector<16x12xf32>
    %c0_37 = arith.constant 0 : index
    %c0_38 = arith.constant 0 : index
    %75 = vector.load %arg13[%c0_37, %c0_38] : memref<12x12xf32, #tpu.memory_space<vmem>>, vector<12x12xf32>
    %76 = arith.mulf %35, %46 : vector<16x12xf32>
    %cst_39 = arith.constant dense<0.000000e+00> : vector<16x12xf32>
    %77 = tpu.matmul %76, %75, %cst_39 {dimension_numbers = #tpu.dot_dimension_numbers<[1], [0], [0], [1], [0, 0, 1, 1], [], []>} : vector<16x12xf32>, vector<12x12xf32>, vector<16x12xf32> -> vector<16x12xf32>
    %78 = arith.mulf %35, %49 : vector<16x12xf32>
    %cst_40 = arith.constant dense<0.000000e+00> : vector<16x12xf32>
    %79 = tpu.matmul %78, %75, %cst_40 {dimension_numbers = #tpu.dot_dimension_numbers<[1], [0], [0], [1], [0, 0, 1, 1], [], []>} : vector<16x12xf32>, vector<12x12xf32>, vector<16x12xf32> -> vector<16x12xf32>
    %80 = arith.mulf %35, %52 : vector<16x12xf32>
    %cst_41 = arith.constant dense<0.000000e+00> : vector<16x12xf32>
    %81 = tpu.matmul %80, %75, %cst_41 {dimension_numbers = #tpu.dot_dimension_numbers<[1], [0], [0], [1], [0, 0, 1, 1], [], []>} : vector<16x12xf32>, vector<12x12xf32>, vector<16x12xf32> -> vector<16x12xf32>
    %82 = arith.maximumf %77, %79 : vector<16x12xf32>
    %83 = arith.maximumf %82, %81 : vector<16x12xf32>
    %84 = arith.subf %77, %83 : vector<16x12xf32>
    %85 = math.exp %84 : vector<16x12xf32>
    %86 = arith.subf %79, %83 : vector<16x12xf32>
    %87 = math.exp %86 : vector<16x12xf32>
    %88 = arith.subf %81, %83 : vector<16x12xf32>
    %89 = math.exp %88 : vector<16x12xf32>
    %90 = arith.addf %85, %87 : vector<16x12xf32>
    %91 = arith.addf %90, %89 : vector<16x12xf32>
    %92 = tpu.reciprocal %91 {approx = true} : vector<16x12xf32> -> vector<16x12xf32>
    %93 = arith.mulf %85, %57 : vector<16x12xf32>
    %94 = arith.mulf %87, %60 : vector<16x12xf32>
    %95 = arith.addf %93, %94 : vector<16x12xf32>
    %96 = arith.mulf %89, %63 : vector<16x12xf32>
    %97 = arith.addf %95, %96 : vector<16x12xf32>
    %98 = arith.mulf %97, %92 : vector<16x12xf32>
    %cst_42 = arith.constant 0.000000e+00 : f32
    %99 = vector.broadcast %cst_42 : f32 to vector<16x12xf32>
    %100 = arith.subf %99, %68 : vector<16x12xf32>
    %101 = math.exp %100 : vector<16x12xf32>
    %cst_43 = arith.constant 1.000000e+00 : f32
    %102 = vector.broadcast %cst_43 : f32 to vector<16x12xf32>
    %103 = arith.addf %102, %101 : vector<16x12xf32>
    %104 = tpu.reciprocal %103 {approx = true} : vector<16x12xf32> -> vector<16x12xf32>
    %105 = arith.mulf %98, %104 : vector<16x12xf32>
    %106 = arith.truncf %105 : vector<16x12xf32> to vector<16x12xbf16>
    %107 = arith.mulf %38, %46 : vector<16x12xf32>
    %cst_44 = arith.constant dense<0.000000e+00> : vector<16x12xf32>
    %108 = tpu.matmul %107, %75, %cst_44 {dimension_numbers = #tpu.dot_dimension_numbers<[1], [0], [0], [1], [0, 0, 1, 1], [], []>} : vector<16x12xf32>, vector<12x12xf32>, vector<16x12xf32> -> vector<16x12xf32>
    %109 = arith.mulf %38, %49 : vector<16x12xf32>
    %cst_45 = arith.constant dense<0.000000e+00> : vector<16x12xf32>
    %110 = tpu.matmul %109, %75, %cst_45 {dimension_numbers = #tpu.dot_dimension_numbers<[1], [0], [0], [1], [0, 0, 1, 1], [], []>} : vector<16x12xf32>, vector<12x12xf32>, vector<16x12xf32> -> vector<16x12xf32>
    %111 = arith.mulf %38, %52 : vector<16x12xf32>
    %cst_46 = arith.constant dense<0.000000e+00> : vector<16x12xf32>
    %112 = tpu.matmul %111, %75, %cst_46 {dimension_numbers = #tpu.dot_dimension_numbers<[1], [0], [0], [1], [0, 0, 1, 1], [], []>} : vector<16x12xf32>, vector<12x12xf32>, vector<16x12xf32> -> vector<16x12xf32>
    %113 = arith.maximumf %108, %110 : vector<16x12xf32>
    %114 = arith.maximumf %113, %112 : vector<16x12xf32>
    %115 = arith.subf %108, %114 : vector<16x12xf32>
    %116 = math.exp %115 : vector<16x12xf32>
    %117 = arith.subf %110, %114 : vector<16x12xf32>
    %118 = math.exp %117 : vector<16x12xf32>
    %119 = arith.subf %112, %114 : vector<16x12xf32>
    %120 = math.exp %119 : vector<16x12xf32>
    %121 = arith.addf %116, %118 : vector<16x12xf32>
    %122 = arith.addf %121, %120 : vector<16x12xf32>
    %123 = tpu.reciprocal %122 {approx = true} : vector<16x12xf32> -> vector<16x12xf32>
    %124 = arith.mulf %116, %57 : vector<16x12xf32>
    %125 = arith.mulf %118, %60 : vector<16x12xf32>
    %126 = arith.addf %124, %125 : vector<16x12xf32>
    %127 = arith.mulf %120, %63 : vector<16x12xf32>
    %128 = arith.addf %126, %127 : vector<16x12xf32>
    %129 = arith.mulf %128, %123 : vector<16x12xf32>
    %cst_47 = arith.constant 0.000000e+00 : f32
    %130 = vector.broadcast %cst_47 : f32 to vector<16x12xf32>
    %131 = arith.subf %130, %71 : vector<16x12xf32>
    %132 = math.exp %131 : vector<16x12xf32>
    %cst_48 = arith.constant 1.000000e+00 : f32
    %133 = vector.broadcast %cst_48 : f32 to vector<16x12xf32>
    %134 = arith.addf %133, %132 : vector<16x12xf32>
    %135 = tpu.reciprocal %134 {approx = true} : vector<16x12xf32> -> vector<16x12xf32>
    %136 = arith.mulf %129, %135 : vector<16x12xf32>
    %137 = arith.truncf %136 : vector<16x12xf32> to vector<16x12xbf16>
    %138 = arith.mulf %41, %46 : vector<16x12xf32>
    %cst_49 = arith.constant dense<0.000000e+00> : vector<16x12xf32>
    %139 = tpu.matmul %138, %75, %cst_49 {dimension_numbers = #tpu.dot_dimension_numbers<[1], [0], [0], [1], [0, 0, 1, 1], [], []>} : vector<16x12xf32>, vector<12x12xf32>, vector<16x12xf32> -> vector<16x12xf32>
    %140 = arith.mulf %41, %49 : vector<16x12xf32>
    %cst_50 = arith.constant dense<0.000000e+00> : vector<16x12xf32>
    %141 = tpu.matmul %140, %75, %cst_50 {dimension_numbers = #tpu.dot_dimension_numbers<[1], [0], [0], [1], [0, 0, 1, 1], [], []>} : vector<16x12xf32>, vector<12x12xf32>, vector<16x12xf32> -> vector<16x12xf32>
    %142 = arith.mulf %41, %52 : vector<16x12xf32>
    %cst_51 = arith.constant dense<0.000000e+00> : vector<16x12xf32>
    %143 = tpu.matmul %142, %75, %cst_51 {dimension_numbers = #tpu.dot_dimension_numbers<[1], [0], [0], [1], [0, 0, 1, 1], [], []>} : vector<16x12xf32>, vector<12x12xf32>, vector<16x12xf32> -> vector<16x12xf32>
    %144 = arith.maximumf %139, %141 : vector<16x12xf32>
    %145 = arith.maximumf %144, %143 : vector<16x12xf32>
    %146 = arith.subf %139, %145 : vector<16x12xf32>
    %147 = math.exp %146 : vector<16x12xf32>
    %148 = arith.subf %141, %145 : vector<16x12xf32>
    %149 = math.exp %148 : vector<16x12xf32>
    %150 = arith.subf %143, %145 : vector<16x12xf32>
    %151 = math.exp %150 : vector<16x12xf32>
    %152 = arith.addf %147, %149 : vector<16x12xf32>
    %153 = arith.addf %152, %151 : vector<16x12xf32>
    %154 = tpu.reciprocal %153 {approx = true} : vector<16x12xf32> -> vector<16x12xf32>
    %155 = arith.mulf %147, %57 : vector<16x12xf32>
    %156 = arith.mulf %149, %60 : vector<16x12xf32>
    %157 = arith.addf %155, %156 : vector<16x12xf32>
    %158 = arith.mulf %151, %63 : vector<16x12xf32>
    %159 = arith.addf %157, %158 : vector<16x12xf32>
    %160 = arith.mulf %159, %154 : vector<16x12xf32>
    %cst_52 = arith.constant 0.000000e+00 : f32
    %161 = vector.broadcast %cst_52 : f32 to vector<16x12xf32>
    %162 = arith.subf %161, %74 : vector<16x12xf32>
    %163 = math.exp %162 : vector<16x12xf32>
    %cst_53 = arith.constant 1.000000e+00 : f32
    %164 = vector.broadcast %cst_53 : f32 to vector<16x12xf32>
    %165 = arith.addf %164, %163 : vector<16x12xf32>
    %166 = tpu.reciprocal %165 {approx = true} : vector<16x12xf32> -> vector<16x12xf32>
    %167 = arith.mulf %160, %166 : vector<16x12xf32>
    %168 = arith.truncf %167 : vector<16x12xf32> to vector<16x12xbf16>
    %c0_54 = arith.constant 0 : index
    %c0_55 = arith.constant 0 : index
    %169 = vector.load %arg14[%c0_54, %c0_55] : memref<12x36xbf16, #tpu.memory_space<vmem>>, vector<12x36xbf16>
    %cst_56 = arith.constant dense<0.000000e+00> : vector<16x36xf32>
    %170 = tpu.matmul %106, %169, %cst_56 {dimension_numbers = #tpu.dot_dimension_numbers<[1], [0], [0], [1], [0, 0, 1, 1], [], []>} : vector<16x12xbf16>, vector<12x36xbf16>, vector<16x36xf32> -> vector<16x36xf32>
    %c0_57 = arith.constant 0 : index
    %c0_58 = arith.constant 0 : index
    %171 = vector.load %arg15[%c0_57, %c0_58] : memref<12x36xbf16, #tpu.memory_space<vmem>>, vector<12x36xbf16>
    %cst_59 = arith.constant dense<0.000000e+00> : vector<16x36xf32>
    %172 = tpu.matmul %137, %171, %cst_59 {dimension_numbers = #tpu.dot_dimension_numbers<[1], [0], [0], [1], [0, 0, 1, 1], [], []>} : vector<16x12xbf16>, vector<12x36xbf16>, vector<16x36xf32> -> vector<16x36xf32>
    %173 = arith.addf %170, %172 : vector<16x36xf32>
    %c0_60 = arith.constant 0 : index
    %c0_61 = arith.constant 0 : index
    %174 = vector.load %arg16[%c0_60, %c0_61] : memref<12x36xbf16, #tpu.memory_space<vmem>>, vector<12x36xbf16>
    %cst_62 = arith.constant dense<0.000000e+00> : vector<16x36xf32>
    %175 = tpu.matmul %168, %174, %cst_62 {dimension_numbers = #tpu.dot_dimension_numbers<[1], [0], [0], [1], [0, 0, 1, 1], [], []>} : vector<16x12xbf16>, vector<12x36xbf16>, vector<16x36xf32> -> vector<16x36xf32>
    %176 = arith.addf %173, %175 : vector<16x36xf32>
    %c0_63 = arith.constant 0 : index
    %c0_64 = arith.constant 0 : index
    %177 = vector.load %arg17[%c0_63, %c0_64] : memref<1x36xf32, #tpu.memory_space<vmem>>, vector<1x36xf32>
    %178 = vector.broadcast %177 : vector<1x36xf32> to vector<16x36xf32>
    %179 = arith.addf %176, %178 : vector<16x36xf32>
    %c0_65 = arith.constant 0 : index
    %180 = memref.load %arg2[%c0_65] : memref<1xf32, #tpu.memory_space<smem>>
    %181 = vector.broadcast %180 : f32 to vector<16x36xf32>
    %182 = arith.mulf %0, %181 : vector<16x36xf32>
    %183 = arith.addf %179, %182 : vector<16x36xf32>
    %c0_66 = arith.constant 0 : index
    %c0_67 = arith.constant 0 : index
    %184 = vector.load %arg18[%c0_66, %c0_67] : memref<16x36xf32, #tpu.memory_space<vmem>>, vector<16x36xf32>
    tpu.vector_store %arg18[%c0_66, %c0_67], %183 {strides = array<i32>} : memref<16x36xf32, #tpu.memory_space<vmem>>, vector<16x36xf32>,
    return
  }
  func.func @transform_0(%arg0: i32) -> (i32, i32) {
    %c0_i32 = arith.constant 0 : i32
    %c0_i32_0 = arith.constant 0 : i32
    return %arg0, %c0_i32 : i32, i32
  }
  func.func @transform_1(%arg0: i32) -> i32 {
    %c0_i32 = arith.constant 0 : i32
    %c0_i32_0 = arith.constant 0 : i32
    return %c0_i32 : i32
  }
  func.func @transform_2(%arg0: i32) -> (i32, i32) {
    %c0_i32 = arith.constant 0 : i32
    %c0_i32_0 = arith.constant 0 : i32
    %c0_i32_1 = arith.constant 0 : i32
    return %c0_i32, %c0_i32_0 : i32, i32
  }
  func.func @transform_3(%arg0: i32) -> (i32, i32) {
    %c0_i32 = arith.constant 0 : i32
    %c0_i32_0 = arith.constant 0 : i32
    %c0_i32_1 = arith.constant 0 : i32
    return %c0_i32, %c0_i32_0 : i32, i32
  }
  func.func @transform_4(%arg0: i32) -> (i32, i32) {
    %c0_i32 = arith.constant 0 : i32
    %c0_i32_0 = arith.constant 0 : i32
    %c0_i32_1 = arith.constant 0 : i32
    return %c0_i32, %c0_i32_0 : i32, i32
  }
  func.func @transform_5(%arg0: i32) -> (i32, i32) {
    %c0_i32 = arith.constant 0 : i32
    %c0_i32_0 = arith.constant 0 : i32
    %c0_i32_1 = arith.constant 0 : i32
    return %c0_i32, %c0_i32_0 : i32, i32
  }
  func.func @transform_6(%arg0: i32) -> (i32, i32) {
    %c0_i32 = arith.constant 0 : i32
    %c0_i32_0 = arith.constant 0 : i32
    %c0_i32_1 = arith.constant 0 : i32
    return %c0_i32, %c0_i32_0 : i32, i32
  }
  func.func @transform_7(%arg0: i32) -> (i32, i32) {
    %c0_i32 = arith.constant 0 : i32
    %c0_i32_0 = arith.constant 0 : i32
    %c0_i32_1 = arith.constant 0 : i32
    return %c0_i32, %c0_i32_0 : i32, i32
  }
  func.func @transform_8(%arg0: i32) -> (i32, i32) {
    %c0_i32 = arith.constant 0 : i32
    %c0_i32_0 = arith.constant 0 : i32
    %c0_i32_1 = arith.constant 0 : i32
    return %c0_i32, %c0_i32_0 : i32, i32
  }
  func.func @transform_9(%arg0: i32) -> (i32, i32) {
    %c0_i32 = arith.constant 0 : i32
    %c0_i32_0 = arith.constant 0 : i32
    %c0_i32_1 = arith.constant 0 : i32
    return %c0_i32, %c0_i32_0 : i32, i32
  }
  func.func @transform_10(%arg0: i32) -> (i32, i32) {
    %c0_i32 = arith.constant 0 : i32
    %c0_i32_0 = arith.constant 0 : i32
    %c0_i32_1 = arith.constant 0 : i32
    return %c0_i32, %c0_i32_0 : i32, i32
  }
  func.func @transform_11(%arg0: i32) -> (i32, i32) {
    %c0_i32 = arith.constant 0 : i32
    %c0_i32_0 = arith.constant 0 : i32
    %c0_i32_1 = arith.constant 0 : i32
    return %c0_i32, %c0_i32_0 : i32, i32
  }
  func.func @transform_12(%arg0: i32) -> (i32, i32) {
    %c0_i32 = arith.constant 0 : i32
    %c0_i32_0 = arith.constant 0 : i32
    %c0_i32_1 = arith.constant 0 : i32
    return %c0_i32, %c0_i32_0 : i32, i32
  }
  func.func @transform_13(%arg0: i32) -> (i32, i32) {
    %c0_i32 = arith.constant 0 : i32
    %c0_i32_0 = arith.constant 0 : i32
    %c0_i32_1 = arith.constant 0 : i32
    return %c0_i32, %c0_i32_0 : i32, i32
  }
  func.func @transform_14(%arg0: i32) -> (i32, i32) {
    %c0_i32 = arith.constant 0 : i32
    %c0_i32_0 = arith.constant 0 : i32
    %c0_i32_1 = arith.constant 0 : i32
    return %c0_i32, %c0_i32_0 : i32, i32
  }
  func.func @transform_15(%arg0: i32) -> (i32, i32) {
    %c0_i32 = arith.constant 0 : i32
    %c0_i32_0 = arith.constant 0 : i32
    %c0_i32_1 = arith.constant 0 : i32
    return %c0_i32, %c0_i32_0 : i32, i32
  }
  func.func @transform_16(%arg0: i32) -> (i32, i32) {
    %c0_i32 = arith.constant 0 : i32
    %c0_i32_0 = arith.constant 0 : i32
    %c0_i32_1 = arith.constant 0 : i32
    return %c0_i32, %c0_i32_0 : i32, i32
  }
  func.func @transform_17(%arg0: i32) -> (i32, i32) {
    %c0_i32 = arith.constant 0 : i32
    %c0_i32_0 = arith.constant 0 : i32
    return %arg0, %c0_i32 : i32, i32
  }
}

</mosaic_0001>

<bundles_post_ra>
// kernel: tpu_custom_call.1
= control target key start
LH: loop header
LB: loop body
LE: loop exit
PB: predicated region body
PF: predicated region fallthrough
CT: control target
= control target key end

     0   :  { %s3067_s0 = inlined_call_operand.hbm [shape: f32[16,36], index: 0, kind: input, shape index: {}]   ;;  %s3068_s1 = inlined_call_operand.<no memory space> [shape: f32[1], index: 1, kind: input, shape index: {}]   ;;  %s3069_s2 = inlined_call_operand.hbm [shape: f32[1,36], index: 2, kind: input, shape index: {}]   ;;  %s3070_s3 = inlined_call_operand.hbm [shape: f32[1,36], index: 3, kind: input, shape index: {}]   ;;  %s3071_s4 = inlined_call_operand.vmem [shape: bf16[12,12], index: 4, kind: input, shape index: {}]   ;;  %s3072_s5 = inlined_call_operand.hbm [shape: f32[1,12], index: 5, kind: input, shape index: {}]   ;;  %s3073_s6 = inlined_call_operand.hbm [shape: bf16[12,12], index: 6, kind: input, shape index: {}]   ;;  %s3074_s7 = inlined_call_operand.hbm [shape: f32[1,12], index: 7, kind: input, shape index: {}]   ;;  %s3075_s8 = inlined_call_operand.hbm [shape: bf16[12,12], index: 8, kind: input, shape index: {}]   ;;  %s3076_s9 = inlined_call_operand.hbm [shape: f32[1,12], index: 9, kind: input, shape index: {}]   ;;  %s3077_s10 = inlined_call_operand.vmem [shape: bf16[12,12], index: 10, kind: input, shape index: {}]   ;;  %s3078_s11 = inlined_call_operand.hbm [shape: f32[1,12], index: 11, kind: input, shape index: {}]   ;;  %s3079_s12 = inlined_call_operand.vmem [shape: f32[12,12], index: 12, kind: input, shape index: {}]   ;;  %s3080_s13 = inlined_call_operand.vmem [shape: bf16[12,36], index: 13, kind: input, shape index: {}]   ;;  %s3081_s14 = inlined_call_operand.vmem [shape: bf16[12,36], index: 14, kind: input, shape index: {}]   ;;  %s3082_s15 = inlined_call_operand.vmem [shape: bf16[12,36], index: 15, kind: input, shape index: {}]   ;;  %s3083_s16 = inlined_call_operand.vmem [shape: f32[1,36], index: 16, kind: input, shape index: {}]   ;;  %s3084_s17 = inlined_call_operand.hbm [shape: f32[16,36], index: 17, kind: output, shape index: {}]  }
   0x1   :  { %3086 = sst [smem:[#allocation25_spill]] %s3067_s0 }
   0x2   :  { %3087 = sst [smem:[#allocation26_spill]] %s3068_s1 }
   0x3   :  { %23 = vsyncpa [#allocation4], 0 }
   0x4   :  { %24 = vsyncpa [#allocation7], 0 }
   0x5   :  { %25 = vsyncpa [#allocation10], 0 }
   0x6   :  { %26 = vsyncpa [#allocation13], 0 }
   0x7   :  { %27 = vsyncpa [#allocation16], 0 }
   0x8   :  { %28 = vsyncpa [#allocation5], 0  ;;  %s2571_s24 = smov [#allocation6]   ;;  %s2572_s26 = smov [#allocation9]  }
   0x9   :  { %s49_s25 = sshll.u32 %s2571_s24, 4  ;;  %s71_s27 = sshll.u32 %s2572_s26, 4  ;;  %s50_s25 = int_to_ptr.vmem [resolvable:$true] %s49_s25  ;;  %s72_s27 = int_to_ptr.vmem [resolvable:$true] %s71_s27 }
   0xa   :  { %s2339_s0 = scalar_lea.hbm %s3069_s2, 16 }
   0xb   :  { %p2340_p0 = scmp.ne.s32.totalorder %s3069_s2, %s2339_s0  ;;  %p2343_p1 = scmp.lt.u32.totalorder %s2339_s0, %s3069_s2 }
   0xd   :  { %p2345_p2 = pnand %p2343_p1, %p2340_p0 }
   0xf   :  { %2348 = shalt.err (!%p2345_p2)
}
  0x10   :  { %s2349_s20 = scalar_lea.vmem %s50_s25, 16  ;;  %s2353_s21 = scalar_lea.vmem %s50_s25, 32 }
  0x11   :  { %p2350_p3 = scmp.ne.s32.totalorder %s50_s25, %s2349_s20  ;;  %p2354_p4 = scmp.lt.s32.totalorder %s50_s25, %s50_s25 }
  0x12   :  { %p2355_p5 = scmp.lt.s32.totalorder %s2353_s21, %s2349_s20 }
  0x14   :  { %p2356_p6 = por %p2355_p5, %p2354_p4 }
  0x16   :  { %p2357_p7 = pnand %p2356_p6, %p2350_p3 }
  0x18   :  { %2360 = shalt.err (!%p2357_p7)
}
  0x19   :  { %52 = dma.hbm_to_vmem [thread:$0]  %s3069_s2, 16, %s50_s25, [#allocation7]  }
  0x1a   :  { %s2361_s28 = scalar_lea.hbm %s3072_s5, 16 }
  0x1b   :  { %p2362_p8 = scmp.ne.s32.totalorder %s3072_s5, %s2361_s28  ;;  %p2365_p9 = scmp.lt.u32.totalorder %s2361_s28, %s3072_s5 }
  0x1d   :  { %p2367_p10 = pnand %p2365_p9, %p2362_p8 }
  0x1f   :  { %2370 = shalt.err (!%p2367_p10)
}
  0x20   :  { %s2371_s19 = scalar_lea.vmem %s72_s27, 16  ;;  %s2375_s1 = scalar_lea.vmem %s72_s27, 32 }
  0x21   :  { %p2372_p11 = scmp.ne.s32.totalorder %s72_s27, %s2371_s19  ;;  %p2376_p12 = scmp.lt.s32.totalorder %s72_s27, %s72_s27 }
  0x22   :  { %p2377_p13 = scmp.lt.s32.totalorder %s2375_s1, %s2371_s19 }
  0x24   :  { %p2378_p0 = por %p2377_p13, %p2376_p12 }
  0x26   :  { %p2379_p1 = pnand %p2378_p0, %p2372_p11 }
  0x28   :  { %2382 = shalt.err (!%p2379_p1)
}
  0x29   :  { %74 = dma.hbm_to_vmem [thread:$0]  %s3072_s5, 16, %s72_s27, [#allocation10]  }
  0x2a   :  { %s2573_s20 = smov [#allocation12]   ;;  %s2574_s22 = smov [#allocation15]  }
  0x2b   :  { %s93_s21 = sshll.u32 %s2573_s20, 4  ;;  %s115_s23 = sshll.u32 %s2574_s22, 4  ;;  %s94_s21 = int_to_ptr.vmem [resolvable:$true] %s93_s21  ;;  %s116_s23 = int_to_ptr.vmem [resolvable:$true] %s115_s23 }
  0x2c   :  { %s2383_s28 = scalar_lea.hbm %s3074_s7, 16 }
  0x2d   :  { %p2384_p2 = scmp.ne.s32.totalorder %s3074_s7, %s2383_s28  ;;  %p2387_p3 = scmp.lt.u32.totalorder %s2383_s28, %s3074_s7 }
  0x2f   :  { %p2389_p4 = pnand %p2387_p3, %p2384_p2 }
  0x31   :  { %2392 = shalt.err (!%p2389_p4)
}
  0x32   :  { %s2393_s5 = scalar_lea.vmem %s94_s21, 16  ;;  %s2397_s27 = scalar_lea.vmem %s94_s21, 32 }
  0x33   :  { %p2394_p5 = scmp.ne.s32.totalorder %s94_s21, %s2393_s5  ;;  %p2398_p6 = scmp.lt.s32.totalorder %s94_s21, %s94_s21 }
  0x34   :  { %p2399_p7 = scmp.lt.s32.totalorder %s2397_s27, %s2393_s5 }
  0x36   :  { %p2400_p8 = por %p2399_p7, %p2398_p6 }
  0x38   :  { %p2401_p9 = pnand %p2400_p8, %p2394_p5 }
  0x3a   :  { %2404 = shalt.err (!%p2401_p9)
}
  0x3b   :  { %96 = dma.hbm_to_vmem [thread:$0]  %s3074_s7, 16, %s94_s21, [#allocation13]  }
  0x3c   :  { %s2405_s20 = scalar_lea.hbm %s3076_s9, 16 }
  0x3d   :  { %p2406_p10 = scmp.ne.s32.totalorder %s3076_s9, %s2405_s20  ;;  %p2409_p11 = scmp.lt.u32.totalorder %s2405_s20, %s3076_s9 }
  0x3f   :  { %p2411_p12 = pnand %p2409_p11, %p2406_p10 }
  0x41   :  { %2414 = shalt.err (!%p2411_p12)
}
  0x42   :  { %s2415_s29 = scalar_lea.vmem %s116_s23, 16  ;;  %s2419_s0 = scalar_lea.vmem %s116_s23, 32 }
  0x43   :  { %p2416_p13 = scmp.ne.s32.totalorder %s116_s23, %s2415_s29  ;;  %p2420_p0 = scmp.lt.s32.totalorder %s116_s23, %s116_s23 }
  0x44   :  { %p2421_p1 = scmp.lt.s32.totalorder %s2419_s0, %s2415_s29 }
  0x46   :  { %p2422_p2 = por %p2421_p1, %p2420_p0 }
  0x48   :  { %p2423_p3 = pnand %p2422_p2, %p2416_p13 }
  0x4a   :  { %2426 = shalt.err (!%p2423_p3)
}
  0x4b   :  { %118 = dma.hbm_to_vmem [thread:$0]  %s3076_s9, 16, %s116_s23, [#allocation16]  }
  0x4c   :  { %s2575_s30 = smov [#allocation3]   ;;  %s3088_s19 = sld [smem:[#allocation25_spill]] }
  0x4d   :  { %s34_s18 = sshll.u32 %s2575_s30, 4  ;;  %s35_s18 = int_to_ptr.vmem [resolvable:$true] %s34_s18 }
  0x52   :  { %s2427_s1 = scalar_lea.hbm %s3088_s19, 256 }
  0x53   :  { %p2428_p4 = scmp.ne.s32.totalorder %s3088_s19, %s2427_s1  ;;  %p2431_p5 = scmp.lt.u32.totalorder %s2427_s1, %s3088_s19 }
  0x55   :  { %p2433_p6 = pnand %p2431_p5, %p2428_p4 }
  0x57   :  { %2436 = shalt.err (!%p2433_p6)
}
  0x58   :  { %s2437_s24 = scalar_lea.vmem %s35_s18, 256  ;;  %p2442_p8 = scmp.lt.s32.totalorder %s35_s18, %s35_s18 }
  0x59   :  { %p2438_p7 = scmp.ne.s32.totalorder %s35_s18, %s2437_s24  ;;  %p2443_p9 = scmp.lt.s32.totalorder %s2437_s24, %s2437_s24 }
  0x5b   :  { %p2444_p10 = por %p2443_p9, %p2442_p8 }
  0x5d   :  { %p2445_p11 = pnand %p2444_p10, %p2438_p7 }
  0x5f   :  { %2448 = shalt.err (!%p2445_p11)
}
  0x60   :  { %s2576_s9 = smov 128   ;;  %s2577_s23 = smov 8  }
  0x61   :  { %40 = dma.hbm_to_vmem [thread:$0]  %s3088_s19, 256, %s35_s18, [#allocation4], %s2576_s9, %s2576_s9, %s2577_s23  }
  0x62   :  { %s2578_s29 = smov [#allocation8]   ;;  %s2579_s7 = smov [#allocation11]  }
  0x63   :  { %s59_s0 = sshll.u32 %s2578_s29, 4  ;;  %s80_s21 = sshll.u32 %s2579_s7, 4  ;;  %s60_s0 = int_to_ptr.vmem [resolvable:$true] %s59_s0  ;;  %s81_s21 = int_to_ptr.vmem [resolvable:$true] %s80_s21 }
  0x64   :  { %s2449_s27 = scalar_lea.hbm %s3070_s3, 16 }
  0x65   :  { %p2450_p12 = scmp.ne.s32.totalorder %s3070_s3, %s2449_s27  ;;  %p2453_p13 = scmp.lt.u32.totalorder %s2449_s27, %s3070_s3 }
  0x67   :  { %p2455_p0 = pnand %p2453_p13, %p2450_p12 }
  0x69   :  { %2458 = shalt.err (!%p2455_p0)
}
  0x6a   :  { %s2459_s18 = scalar_lea.vmem %s60_s0, 16  ;;  %s2463_s19 = scalar_lea.vmem %s60_s0, 32 }
  0x6b   :  { %p2460_p1 = scmp.ne.s32.totalorder %s60_s0, %s2459_s18  ;;  %p2464_p2 = scmp.lt.s32.totalorder %s60_s0, %s60_s0 }
  0x6c   :  { %p2465_p3 = scmp.lt.s32.totalorder %s2463_s19, %s2459_s18 }
  0x6e   :  { %p2466_p4 = por %p2465_p3, %p2464_p2 }
  0x70   :  { %p2467_p5 = pnand %p2466_p4, %p2460_p1 }
  0x72   :  { %2470 = shalt.err (!%p2467_p5)
}
  0x73   :  { %62 = dma.hbm_to_vmem [thread:$0]  %s3070_s3, 16, %s60_s0, [#allocation7]  }
  0x74   :  { %s2471_s29 = scalar_lea.hbm %s3073_s6, 128 }
  0x75   :  { %p2472_p6 = scmp.ne.s32.totalorder %s3073_s6, %s2471_s29  ;;  %p2475_p7 = scmp.lt.u32.totalorder %s2471_s29, %s3073_s6 }
  0x77   :  { %p2477_p8 = pnand %p2475_p7, %p2472_p6 }
  0x79   :  { %2480 = shalt.err (!%p2477_p8)
}
  0x7a   :  { %s2481_s1 = scalar_lea.vmem %s81_s21, 128  ;;  %p2486_p10 = scmp.lt.s32.totalorder %s81_s21, %s81_s21 }
  0x7b   :  { %p2482_p9 = scmp.ne.s32.totalorder %s81_s21, %s2481_s1  ;;  %p2487_p11 = scmp.lt.s32.totalorder %s2481_s1, %s2481_s1 }
  0x7d   :  { %p2488_p12 = por %p2487_p11, %p2486_p10 }
  0x7f   :  { %p2489_p13 = pnand %p2488_p12, %p2482_p9 }
  0x81   :  { %2492 = shalt.err (!%p2489_p13)
}
  0x82   :  { %s2580_s3 = smov 64   ;;  %s2581_s0 = smov 4  }
  0x83   :  { %86 = dma.hbm_to_vmem [thread:$0]  %s3073_s6, 128, %s81_s21, [#allocation10], %s2580_s3, %s2580_s3, %s2581_s0  }
  0x84   :  { %s2582_s20 = smov [#allocation14]   ;;  %s2583_s19 = smov [#allocation17]  }
  0x85   :  { %s102_s18 = sshll.u32 %s2582_s20, 4  ;;  %s127_s22 = sshll.u32 %s2583_s19, 4  ;;  %s103_s18 = int_to_ptr.vmem [resolvable:$true] %s102_s18  ;;  %s128_s22 = int_to_ptr.vmem [resolvable:$true] %s127_s22 }
  0x86   :  { %s2493_s28 = scalar_lea.hbm %s3075_s8, 128 }
  0x87   :  { %p2494_p0 = scmp.ne.s32.totalorder %s3075_s8, %s2493_s28  ;;  %p2497_p1 = scmp.lt.u32.totalorder %s2493_s28, %s3075_s8 }
  0x89   :  { %p2499_p2 = pnand %p2497_p1, %p2494_p0 }
  0x8b   :  { %2502 = shalt.err (!%p2499_p2)
}
  0x8c   :  { %s2503_s6 = scalar_lea.vmem %s103_s18, 128  ;;  %p2508_p4 = scmp.lt.s32.totalorder %s103_s18, %s103_s18 }
  0x8d   :  { %p2504_p3 = scmp.ne.s32.totalorder %s103_s18, %s2503_s6  ;;  %p2509_p5 = scmp.lt.s32.totalorder %s2503_s6, %s2503_s6 }
  0x8f   :  { %p2510_p6 = por %p2509_p5, %p2508_p4 }
  0x91   :  { %p2511_p7 = pnand %p2510_p6, %p2504_p3 }
  0x93   :  { %2514 = shalt.err (!%p2511_p7)
}
  0x94   :  { %108 = dma.hbm_to_vmem [thread:$0]  %s3075_s8, 128, %s103_s18, [#allocation13], %s2580_s3, %s2580_s3, %s2581_s0  }
  0x95   :  { %s2515_s25 = scalar_lea.hbm %s3078_s11, 16 }
  0x96   :  { %p2516_p8 = scmp.ne.s32.totalorder %s3078_s11, %s2515_s25  ;;  %p2519_p9 = scmp.lt.u32.totalorder %s2515_s25, %s3078_s11 }
  0x98   :  { %p2521_p10 = pnand %p2519_p9, %p2516_p8 }
  0x9a   :  { %2524 = shalt.err (!%p2521_p10)
}
  0x9b   :  { %s2525_s28 = scalar_lea.vmem %s128_s22, 16  ;;  %s2529_s29 = scalar_lea.vmem %s128_s22, 32 }
  0x9c   :  { %p2526_p11 = scmp.ne.s32.totalorder %s128_s22, %s2525_s28  ;;  %p2530_p12 = scmp.lt.s32.totalorder %s128_s22, %s128_s22 }
  0x9d   :  { %p2531_p13 = scmp.lt.s32.totalorder %s2529_s29, %s2525_s28 }
  0x9f   :  { %p2532_p0 = por %p2531_p13, %p2530_p12 }
  0xa1   :  { %p2533_p1 = pnand %p2532_p0, %p2526_p11 }
  0xa3   :  { %2536 = shalt.err (!%p2533_p1)
}
  0xa4   :  { %130 = dma.hbm_to_vmem [thread:$0]  %s3078_s11, 16, %s128_s22, [#allocation16]  }
  0xa5   :  { %2559 = dma.done.wait [#allocation4], 256  }
  0xa6   :  { %2560 = vsyncadd [#allocation4], 4294967040 }
  0xa7   :  { %2561 = dma.done.wait [#allocation7], 32  }
  0xa8   :  { %2562 = vsyncadd [#allocation7], 4294967264 }
  0xa9   :  { %2563 = dma.done.wait [#allocation10], 144  }
  0xaa   :  { %2564 = vsyncadd [#allocation10], 4294967152 }
  0xab   :  { %2565 = dma.done.wait [#allocation13], 144  }
  0xac   :  { %2566 = vsyncadd [#allocation13], 4294967152 }
  0xad   :  { %2567 = dma.done.wait [#allocation16], 32  }
  0xae   :  { %2568 = vsyncadd [#allocation16], 4294967264  ;;  %vm171_vm0 = vcmask 293888   ;;  %v2791_v0 = vld [vmem:[#allocation3] sm:$0xff]  ;;  %v2793_v1 = vld [vmem:[#allocation3 + $0x8] sm:$0xff]  ;;  %vm236_vm1 = vcmask 1045504  }
  0xaf   :  { %v172_v2 = vsel %vm171_vm0, %v2791_v0, 0.0  ;;  %v175_v3 = vsel %vm171_vm0, %v2793_v1, 0.0  ;;  %v2256_v14 = vld [vmem:[%s3071_s4] sm:$0x3f]   ;;  %v2584_v15 = vmov 0.0   ;;  %vm2585_vm2 = vmmov 0  }
  0xb0   :  { %173 = vadd.xlane.f32.xlu0 %v172_v2  ;;  %2030 = vmatprep.subr.bf16.mxu0 %v2584_v15  ;;  %v238_v16 = vsel %vm236_vm1, %v2256_v14, 0  ;;  %v1908_v25 = vld [vmem:[#allocation6] ss:$0 sm:$0xff]  ;;  %v1909_v29 = vld [vmem:[#allocation8] ss:$0 sm:$0xff]  ;;  %vm232_vm3 = vcmask 97280  }
  0xb1   :  { %2036 = vmatprep.subr.bf16.mxu1 %v2584_v15  ;;  %2031 = vmatpush3.bf16.msra.mxu0 %v238_v16  ;;  %s2586_s4 = smov 104   ;;  %s2587_s18 = smov 116   ;;  %v2257_v34 = vld [vmem:[#allocation11] sm:$0x3f]   ;;  %v2258_v38 = vld [vmem:[#allocation14] sm:$0x3f]  }
  0xb2   :  { %2032 = vmatprep.mubr.msk.bf16.mxu0 %vm2585_vm2, %v2584_v15  ;;  %2037 = vmatpush3.bf16.msra.mxu1 %v238_v16  ;;  %v389_v35 = vsel %vm236_vm1, %v2257_v34, 0  ;;  %v529_v39 = vsel %vm236_vm1, %v2258_v38, 0  ;;  %v2259_v40 = vld [vmem:[%s3077_s10] sm:$0x3f]   ;;  %v795_v43 = vld [vmem:[%s3079_s12 + $0x8] sm:$0xf] }
  0xb3   :  { %2042 = vmatprep.subr.bf16.mxu0 %v2584_v15  ;;  %2038 = vmatprep.mubr.msk.bf16.mxu1 %vm2585_vm2, %v2584_v15  ;;  %v669_v41 = vsel %vm236_vm1, %v2259_v40, 0  ;;  %v794_v42 = vld [vmem:[%s3079_s12] sm:$0xff]  ;;  %vm804_vm4 = vcmask 1043456   ;;  %vm2588_vm5 = vmmov 1   ;;  %v1910_v58 = vld [vmem:[#allocation9] ss:$0 sm:$0xff] }
  0xb4   :  { %176 = vadd.xlane.f32.xlu0 %v175_v3  ;;  %2048 = vmatprep.subr.bf16.mxu1 %v2584_v15  ;;  %v2867_v44 = vpack.c.bf16 %v795_v43, %v794_v42  ;;  %vm2869_vm6 = vmpackc.low %vm804_vm4, %vm2588_vm5  ;;  %v1915_v59 = vld [vmem:[#allocation12] ss:$0 sm:$0xff]  ;;  %s3091_s25 = sld [smem:[#allocation26_spill]]  ;;  %s2589_s24 = smov [#allocation18]  }
  0xb5   :  { %s1892_s26 = sshll.u32 %s2589_s24, 4  ;;  %s1893_s26 = int_to_ptr.vmem [resolvable:$true] %s1892_s26 }
  0xb6   :  { %p2542_p3 = scmp.lt.s32.totalorder %s1893_s26, %s1893_s26 }
 0x13d   :  { %v174_v4 = vpop.xlane.xlu0 %173 }
 0x13e   :  { %v179_v5 = vmul.f32 0.027777778, %v174_v4 }
 0x140   :  { %v181_v6 = vsub.f32 %v2791_v0, %v179_v5 }
 0x141   :  { %v177_v7 = vpop.xlane.xlu0 %176 }
 0x142   :  { %v180_v8 = vmul.f32 0.027777778, %v177_v7  ;;  %v183_v9 = vmul.f32 %v181_v6, %v181_v6 }
 0x144   :  { %v182_v10 = vsub.f32 %v2793_v1, %v180_v8  ;;  %v185_v11 = vsel %vm171_vm0, %v183_v9, 0.0 }
 0x145   :  { %186 = vadd.xlane.f32.xlu1 %v185_v11 }
 0x146   :  { %v184_v12 = vmul.f32 %v182_v10, %v182_v10 }
 0x148   :  { %v188_v13 = vsel %vm171_vm0, %v184_v12, 0.0 }
 0x149   :  { %189 = vadd.xlane.f32.xlu1 %v188_v13 }
 0x1d2   :  { %v187_v17 = vpop.xlane.xlu1 %186 }
 0x1d3   :  { %v191_v18 = vmul.f32 0.027777778, %v187_v17 }
 0x1d5   :  { %v193_v19 = vadd.f32 1e-06, %v191_v18 }
 0x1d6   :  { %v190_v20 = vpop.xlane.xlu1 %189 }
 0x1d7   :  { %2263 = vrsqrt.f32 %v193_v19  ;;  %v192_v21 = vmul.f32 0.027777778, %v190_v20 }
 0x1d9   :  { %v194_v22 = vadd.f32 1e-06, %v192_v21 }
 0x1db   :  { %2265 = vrsqrt.f32 %v194_v22 }
 0x1e1   :  { %v2264_v23 = vpop.eup %2263 }
 0x1e2   :  { %v197_v24 = vmul.f32 %v2264_v23, %v181_v6 }
 0x1e4   :  { %v206_v27 = vmul.f32 %v1908_v25, %v197_v24 }
 0x1e5   :  { %v2266_v26 = vpop.eup %2265 }
 0x1e6   :  { %v198_v28 = vmul.f32 %v2266_v26, %v182_v10  ;;  %v215_v31 = vadd.f32 %v1909_v29, %v206_v27 }
 0x1e8   :  { %v207_v30 = vmul.f32 %v1908_v25, %v198_v28 }
 0x1ea   :  { %v216_v32 = vadd.f32 %v1909_v29, %v207_v30 }
 0x1ec   :  { %v217_v33 = vpack.c.bf16 %v216_v32, %v215_v31 }
 0x1ee   :  { %328 = vrot.lane.b32.xlu1 %v217_v33, %s2586_s4  ;;  %282 = vrot.lane.b32.xlu0 %v217_v33, %s2587_s18 }
 0x1ef   :  { %2033 = vmatmul.mubr.msk.bf16.vlgmr.msra.gmra.mrb[0].mxu0 %vm232_vm3, %v217_v33 }
 0x1f0   :  { %2043 = vmatpush3.bf16.msra.mxu0 %v238_v16  ;;  %2044 = vmatprep.mubr.msk.bf16.mxu0 %vm2585_vm2, %v2584_v15 }
 0x1f1   :  { %2054 = vmatprep.subr.bf16.mxu0 %v2584_v15 }
 0x260   :  { %v329_v36 = vpop.permute.xlu1 %328  ;;  %v283_v37 = vpop.permute.xlu0 %282 }
 0x261   :  { %2039 = vmatmul.mubr.msk.bf16.vlgmr.msra.gmra.mrb[0].mxu1 %vm232_vm3, %v283_v37  ;;  %2045 = vmatmul.mubr.msk.bf16.vlgmr.msra.gmra.mrb[4].mxu0 %vm232_vm3, %v329_v36 }
 0x262   :  { %2049 = vmatpush3.bf16.msra.mxu1 %v389_v35  ;;  %2055 = vmatpush3.bf16.msra.mxu0 %v389_v35 }
 0x263   :  { %2050 = vmatprep.mubr.msk.bf16.mxu1 %vm2585_vm2, %v2584_v15  ;;  %2056 = vmatprep.mubr.msk.bf16.mxu0 %vm2585_vm2, %v2584_v15 }
 0x264   :  { %2060 = vmatprep.subr.bf16.mxu1 %v2584_v15  ;;  %2066 = vmatprep.subr.bf16.mxu0 %v2584_v15 }
 0x269   :  { %2051 = vmatmul.mubr.msk.bf16.vlgmr.msra.gmra.mrb[4].mxu1 %vm232_vm3, %v217_v33  ;;  %2057 = vmatmul.mubr.msk.bf16.vlgmr.msra.gmra.mrb[8].mxu0 %vm232_vm3, %v283_v37 }
 0x26a   :  { %2061 = vmatpush3.bf16.msra.mxu1 %v389_v35  ;;  %2067 = vmatpush3.bf16.msra.mxu0 %v529_v39 }
 0x26b   :  { %2062 = vmatprep.mubr.msk.bf16.mxu1 %vm2585_vm2, %v2584_v15  ;;  %2068 = vmatprep.mubr.msk.bf16.mxu0 %vm2585_vm2, %v2584_v15 }
 0x26c   :  { %2072 = vmatprep.subr.bf16.mxu1 %v2584_v15  ;;  %2078 = vmatprep.subr.bf16.mxu0 %v2584_v15 }
 0x271   :  { %2063 = vmatmul.mubr.msk.bf16.vlgmr.msra.gmra.mrb[8].mxu1 %vm232_vm3, %v329_v36  ;;  %2069 = vmatmul.mubr.msk.bf16.vlgmr.msra.gmra.mrb[12].mxu0 %vm232_vm3, %v217_v33 }
 0x272   :  { %2073 = vmatpush3.bf16.msra.mxu1 %v529_v39  ;;  %2079 = vmatpush3.bf16.msra.mxu0 %v529_v39 }
 0x273   :  { %2074 = vmatprep.mubr.msk.bf16.mxu1 %vm2585_vm2, %v2584_v15  ;;  %2080 = vmatprep.mubr.msk.bf16.mxu0 %vm2585_vm2, %v2584_v15 }
 0x274   :  { %2084 = vmatprep.subr.bf16.mxu1 %v2584_v15  ;;  %2090 = vmatprep.subr.bf16.mxu0 %v2584_v15 }
 0x279   :  { %2075 = vmatmul.mubr.msk.bf16.vlgmr.msra.gmra.mrb[12].mxu1 %vm232_vm3, %v283_v37  ;;  %2081 = vmatmul.mubr.msk.bf16.vlgmr.msra.gmra.mrb[16].mxu0 %vm232_vm3, %v329_v36 }
 0x27a   :  { %2085 = vmatpush3.bf16.msra.mxu1 %v669_v41  ;;  %2091 = vmatpush3.bf16.msra.mxu0 %v669_v41 }
 0x27b   :  { %2086 = vmatprep.mubr.msk.bf16.mxu1 %vm2585_vm2, %v2584_v15  ;;  %2092 = vmatprep.mubr.msk.bf16.mxu0 %vm2585_vm2, %v2584_v15 }
 0x27c   :  { %2096 = vmatprep.subr.bf16.mxu1 %v2584_v15  ;;  %2185 = vmatprep.subr.msk.bf16.mxu0 %vm2869_vm6, %v2867_v44 }
 0x281   :  { %2087 = vmatmul.mubr.msk.bf16.vlgmr.msra.gmra.mrb[16].mxu1 %vm232_vm3, %v217_v33  ;;  %2093 = vmatmul.mubr.msk.bf16.vlgmr.msra.gmra.mrb[20].mxu0 %vm232_vm3, %v283_v37 }
 0x282   :  { %2097 = vmatpush3.bf16.msra.mxu1 %v669_v41  ;;  %2098 = vmatprep.mubr.msk.bf16.mxu1 %vm2585_vm2, %v2584_v15 }
 0x283   :  { %2191 = vmatprep.subr.msk.bf16.mxu1 %vm2869_vm6, %v2867_v44  ;;  %2188 = vmatpush3.bf16.msk.msra.mxu0 %vm2869_vm6, %v2867_v44 }
 0x284   :  { %2197 = vmatprep.subr.msk.bf16.mxu0 %vm2869_vm6, %v2867_v44 }
 0x289   :  { %2099 = vmatmul.mubr.msk.bf16.vlgmr.msra.gmra.mrb[20].mxu1 %vm232_vm3, %v329_v36 }
 0x28a   :  { %2194 = vmatpush3.bf16.msk.msra.mxu1 %vm2869_vm6, %v2867_v44 }
 0x28b   :  { %2203 = vmatprep.subr.msk.bf16.mxu1 %vm2869_vm6, %v2867_v44 }
 0x2c2   :  { %v274_v46 = vpop.f32.mrb[0].mxu0 }
 0x2c3   :  { %v2034_v47 = vpop.f32.mrb[1].mxu0  ;;  %v275_v60 = vadd.f32 %v1910_v58, %v274_v46 }
 0x2c4   :  { %v277_v48 = vpop.f32.mrb[2].mxu0 }
 0x2c5   :  { %v2035_v49 = vpop.f32.mrb[3].mxu0  ;;  %v278_v7 = vadd.f32 %v1910_v58, %v277_v48 }
 0x334   :  { %v321_v50 = vpop.f32.mrb[0].mxu1  ;;  %v367_v51 = vpop.f32.mrb[4].mxu0 }
 0x335   :  { %v2040_v52 = vpop.f32.mrb[1].mxu1  ;;  %v2046_v53 = vpop.f32.mrb[5].mxu0  ;;  %v322_v63 = vadd.f32 %v1910_v58, %v321_v50  ;;  %v368_v2 = vadd.f32 %v1910_v58, %v367_v51 }
 0x336   :  { %v324_v54 = vpop.f32.mrb[2].mxu1  ;;  %v370_v55 = vpop.f32.mrb[6].mxu0 }
 0x337   :  { %v2041_v56 = vpop.f32.mrb[3].mxu1  ;;  %v2047_v57 = vpop.f32.mrb[7].mxu0  ;;  %v325_v8 = vadd.f32 %v1910_v58, %v324_v54  ;;  %v371_v9 = vadd.f32 %v1910_v58, %v370_v55 }
 0x33c   :  { %v425_v61 = vpop.f32.mrb[4].mxu1  ;;  %v466_v62 = vpop.f32.mrb[8].mxu0 }
 0x33d   :  { %v426_v3 = vadd.f32 %v1915_v59, %v425_v61  ;;  %v467_v4 = vadd.f32 %v1915_v59, %v466_v62  ;;  %v2052_v5 = vpop.f32.mrb[5].mxu1  ;;  %v2058_v6 = vpop.f32.mrb[9].mxu0 }
 0x33e   :  { %v428_v10 = vpop.f32.mrb[6].mxu1  ;;  %v469_v11 = vpop.f32.mrb[10].mxu0  ;;  %v2261_v5 = vld [vmem:[%s3081_s14] sm:$0x3f]  }
 0x33f   :  { %v796_v12 = vmul.f32 %v426_v3, %v275_v60  ;;  %v1102_v13 = vmul.f32 %v426_v3, %v322_v63  ;;  %v2891_v14 = vmul.f32 %v426_v3, %v368_v2  ;;  %v883_v16 = vmul.f32 %v467_v4, %v275_v60  ;;  %v2053_v17 = vpop.f32.mrb[7].mxu1  ;;  %v2059_v18 = vpop.f32.mrb[11].mxu0 }
 0x340   :  { %v1185_v19 = vmul.f32 %v467_v4, %v322_v63  ;;  %v1487_v20 = vmul.f32 %v467_v4, %v368_v2  ;;  %v429_v21 = vadd.f32 %v1915_v59, %v428_v10  ;;  %v470_v22 = vadd.f32 %v1915_v59, %v469_v11 }
 0x341   :  { %2106 = vmatprep.mubr.msk.f32.mxu0 %vm232_vm3, %v796_v12  ;;  %2113 = vmatprep.mubr.msk.f32.mxu1 %vm232_vm3, %v883_v16  ;;  %v1719_v6 = vsel %vm236_vm1, %v2261_v5, 0 }
 0x342   :  { %v797_v23 = vmul.f32 %v429_v21, %v278_v7  ;;  %v1103_v24 = vmul.f32 %v429_v21, %v325_v8  ;;  %v1405_v25 = vmul.f32 %v429_v21, %v371_v9  ;;  %v884_v26 = vmul.f32 %v470_v22, %v278_v7 }
 0x343   :  { %v1186_v27 = vmul.f32 %v470_v22, %v325_v8  ;;  %v1488_v28 = vmul.f32 %v470_v22, %v371_v9 }
 0x344   :  { %2107 = vmatmul.mubr.msk.f32.vlgmr.msra.gmra.mrb[24].mxu0 %vm232_vm3, %v797_v23  ;;  %2114 = vmatmul.mubr.msk.f32.vlgmr.msra.gmra.mrb[24].mxu1 %vm232_vm3, %v884_v26  ;;  %v507_v29 = vpop.f32.mrb[8].mxu1  ;;  %v2897_v30 = vpop.f32.mrb[12].mxu0 }
 0x345   :  { %v508_v31 = vadd.f32 %v1915_v59, %v507_v29  ;;  %2206 = vmatpush3.bf16.msk.msra.mxu1 %vm2869_vm6, %v2867_v44  ;;  %2127 = vmatprep.mubr.msk.f32.mxu1 %vm232_vm3, %v1102_v13  ;;  %v2064_v32 = vpop.f32.mrb[9].mxu1  ;;  %v2070_v33 = vpop.f32.mrb[13].mxu0 }
 0x346   :  { %v510_v34 = vpop.f32.mrb[10].mxu1  ;;  %v2903_v35 = vpop.f32.mrb[14].mxu0  ;;  %2200 = vmatpush3.bf16.msk.msra.mxu0 %vm2869_vm6, %v2867_v44  ;;  %2215 = vmatprep.subr.msk.bf16.mxu1 %vm2869_vm6, %v2867_v44 }
 0x347   :  { %v966_v36 = vmul.f32 %v508_v31, %v275_v60  ;;  %v1268_v37 = vmul.f32 %v508_v31, %v322_v63  ;;  %v1570_v38 = vmul.f32 %v508_v31, %v368_v2  ;;  %v511_v39 = vadd.f32 %v1915_v59, %v510_v34  ;;  %v2065_v40 = vpop.f32.mrb[11].mxu1  ;;  %v2071_v41 = vpop.f32.mrb[15].mxu0  ;;  %2209 = vmatprep.subr.msk.bf16.mxu0 %vm2869_vm6, %v2867_v44 }
 0x348   :  { %2128 = vmatmul.mubr.msk.f32.vlgmr.msra.gmra.mrb[26].mxu1 %vm232_vm3, %v1103_v24 }
 0x349   :  { %v967_v42 = vmul.f32 %v511_v39, %v278_v7  ;;  %v1269_v43 = vmul.f32 %v511_v39, %v325_v8  ;;  %v1571_v46 = vmul.f32 %v511_v39, %v371_v9  ;;  %2218 = vmatpush3.bf16.msk.msra.mxu1 %vm2869_vm6, %v2867_v44  ;;  %2120 = vmatprep.mubr.msk.f32.mxu0 %vm232_vm3, %v966_v36  ;;  %v1925_v7 = vld [vmem:[#allocation17] ss:$0 sm:$0xff] }
 0x34a   :  { %2141 = vmatprep.mubr.msk.f32.mxu1 %vm232_vm3, %v1268_v37  ;;  %2227 = vmatprep.subr.msk.bf16.mxu1 %vm2869_vm6, %v2867_v44 }
 0x34b   :  { %2121 = vmatmul.mubr.msk.f32.vlgmr.msra.gmra.mrb[26].mxu0 %vm232_vm3, %v967_v42 }
 0x34c   :  { %2212 = vmatpush3.bf16.msk.msra.mxu0 %vm2869_vm6, %v2867_v44  ;;  %2142 = vmatmul.mubr.msk.f32.vlgmr.msra.gmra.mrb[28].mxu1 %vm232_vm3, %v1269_v43  ;;  %v2928_v47 = vpop.f32.mrb[12].mxu1  ;;  %v2930_v48 = vpop.f32.mrb[16].mxu0 }
 0x34d   :  { %2134 = vmatprep.mubr.msk.f32.mxu0 %vm232_vm3, %v1185_v19  ;;  %2230 = vmatpush3.bf16.msk.msra.mxu1 %vm2869_vm6, %v2867_v44  ;;  %v2076_v49 = vpop.f32.mrb[13].mxu1  ;;  %v2082_v50 = vpop.f32.mrb[17].mxu0 }
 0x34e   :  { %2155 = vmatprep.mubr.msk.f32.mxu1 %vm232_vm3, %v1487_v20  ;;  %v2937_v51 = vpop.f32.mrb[14].mxu1  ;;  %v2939_v52 = vpop.f32.mrb[18].mxu0  ;;  %2221 = vmatprep.subr.msk.bf16.mxu0 %vm2869_vm6, %v2867_v44 }
 0x34f   :  { %v2077_v53 = vpop.f32.mrb[15].mxu1  ;;  %v2083_v54 = vpop.f32.mrb[19].mxu0  ;;  %2135 = vmatmul.mubr.msk.f32.vlgmr.msra.gmra.mrb[28].mxu0 %vm232_vm3, %v1186_v27  ;;  %2165 = vmatprep.subr.bf16.mxu1 %v2584_v15 }
 0x350   :  { %2156 = vmatmul.mubr.msk.f32.vlgmr.msra.gmra.mrb[30].mxu1 %vm232_vm3, %v1488_v28  ;;  %2224 = vmatpush3.bf16.msk.msra.mxu0 %vm2869_vm6, %v2867_v44  ;;  %v1920_v54 = vld [vmem:[#allocation15] ss:$0 sm:$0xff] }
 0x351   :  { %2148 = vmatprep.mubr.msk.f32.mxu0 %vm232_vm3, %v2891_v14  ;;  %2233 = vmatprep.subr.msk.bf16.mxu0 %vm2869_vm6, %v2867_v44  ;;  %v2981_v5 = vadd.f32 %v1920_v54, %v2903_v35 }
 0x352   :  { %2167 = vmatprep.mubr.msk.bf16.mxu1 %vm2585_vm2, %v2584_v15  ;;  %2166 = vmatpush3.bf16.msra.mxu1 %v1719_v6 }
 0x353   :  { %2149 = vmatmul.mubr.msk.f32.vlgmr.msra.gmra.mrb[30].mxu0 %vm232_vm3, %v1405_v25  ;;  %2177 = vmatprep.subr.bf16.mxu1 %v2584_v15 }
 0x354   :  { %v705_v55 = vpop.f32.mrb[16].mxu1  ;;  %v746_v56 = vpop.f32.mrb[20].mxu0  ;;  %2236 = vmatpush3.bf16.msk.msra.mxu0 %vm2869_vm6, %v2867_v44  ;;  %2162 = vmatprep.mubr.msk.f32.mxu0 %vm232_vm3, %v1570_v38  ;;  %v2260_v44 = vld [vmem:[%s3080_s13] sm:$0x3f]  }
 0x355   :  { %v2088_v57 = vpop.f32.mrb[17].mxu1  ;;  %v2094_v58 = vpop.f32.mrb[21].mxu0  ;;  %2171 = vmatprep.subr.bf16.mxu0 %v2584_v15  ;;  %v1771_v4 = vsel %vm236_vm1, %v2260_v44, 0  ;;  %v706_v11 = vadd.f32 %v1925_v7, %v705_v55  ;;  %v747_v12 = vadd.f32 %v1925_v7, %v746_v56 }
 0x356   :  { %v708_v59 = vpop.f32.mrb[18].mxu1  ;;  %v749_v60 = vpop.f32.mrb[22].mxu0 }
 0x357   :  { %v2089_v61 = vpop.f32.mrb[19].mxu1  ;;  %v2095_v62 = vpop.f32.mrb[23].mxu0  ;;  %2163 = vmatmul.mubr.msk.f32.vlgmr.msra.gmra.mrb[32].mxu0 %vm232_vm3, %v1571_v46  ;;  %v709_v8 = vadd.f32 %v1925_v7, %v708_v59  ;;  %v750_v13 = vadd.f32 %v1925_v7, %v749_v60  ;;  %v1089_v16 = vsub.f32 0.0, %v706_v11  ;;  %v1391_v18 = vsub.f32 0.0, %v747_v12 }
 0x358   :  { %2173 = vmatprep.mubr.msk.bf16.mxu0 %vm2585_vm2, %v2584_v15  ;;  %2172 = vmatpush3.bf16.msra.mxu0 %v1771_v4 }
 0x359   :  { %v1090_v9 = vsub.f32 0.0, %v709_v8  ;;  %v1392_v21 = vsub.f32 0.0, %v750_v13  ;;  %v1091_v27 = vmul.f32 1.442695, %v1089_v16  ;;  %v1393_v29 = vmul.f32 1.442695, %v1391_v18 }
 0x35b   :  { %v1093_v10 = vmul.f32 1.442695, %v1090_v9  ;;  %v1395_v32 = vmul.f32 1.442695, %v1392_v21 }
 0x35c   :  { %v787_v63 = vpop.f32.mrb[20].mxu1 }
 0x35d   :  { %v2100_v2 = vpop.f32.mrb[21].mxu1  ;;  %2267 = vpow2.f32 %v1093_v10  ;;  %v788_v14 = vadd.f32 %v1925_v7, %v787_v63 }
 0x35e   :  { %v790_v3 = vpop.f32.mrb[22].mxu1  ;;  %2269 = vpow2.f32 %v1091_v27  ;;  %v2978_v2 = vadd.f32 %v1920_v54, %v2897_v30  ;;  %v2994_v27 = vadd.f32 %v1920_v54, %v2928_v47  ;;  %v3004_v47 = vadd.f32 %v1920_v54, %v2937_v51 }
 0x35f   :  { %v2101_v45 = vpop.f32.mrb[23].mxu1  ;;  %v791_v17 = vadd.f32 %v1925_v7, %v790_v3  ;;  %v1693_v25 = vsub.f32 0.0, %v788_v14  ;;  %2271 = vpow2.f32 %v1393_v29 }
 0x360   :  { %2273 = vpow2.f32 %v1395_v32 }
 0x361   :  { %v1694_v28 = vsub.f32 0.0, %v791_v17  ;;  %v1695_v36 = vmul.f32 1.442695, %v1693_v25 }
 0x363   :  { %v1697_v37 = vmul.f32 1.442695, %v1694_v28  ;;  %2275 = vpow2.f32 %v1695_v36  ;;  %v2997_v28 = vadd.f32 %v1920_v54, %v2930_v48  ;;  %v3007_v48 = vadd.f32 %v1920_v54, %v2939_v52 }
 0x365   :  { %2277 = vpow2.f32 %v1697_v37 }
 0x367   :  { %v2268_v34 = vpop.eup %2267 }
 0x368   :  { %v1096_v42 = vadd.f32 1.0, %v2268_v34  ;;  %v2984_v13 = vpop.eup %2269 }
 0x369   :  { %v2986_v18 = vpop.eup %2271 }
 0x36a   :  { %2279 = vrcp.f32 %v1096_v42  ;;  %v2988_v21 = vpop.eup %2273 }
 0x417   :  { %v2108_v19 = vpop.f32.mrb[24].mxu0  ;;  %v2115_v20 = vpop.f32.mrb[24].mxu1 }
 0x418   :  { %v1050_v22 = vmax.f32 %v2108_v19, %v2115_v20  ;;  %v874_v23 = vpop.f32.mrb[25].mxu0  ;;  %v957_v24 = vpop.f32.mrb[25].mxu1 }
 0x419   :  { %v1049_v26 = vmax.f32 %v874_v23, %v957_v24 }
 0x41b   :  { %v2129_v31 = vpop.f32.mrb[26].mxu1 }
 0x41c   :  { %v2975_v33 = vpop.f32.mrb[27].mxu1 }
 0x41e   :  { %v2122_v38 = vpop.f32.mrb[26].mxu0 }
 0x41f   :  { %v1052_v39 = vmax.f32 %v1050_v22, %v2122_v38  ;;  %v2143_v40 = vpop.f32.mrb[28].mxu1  ;;  %v1040_v41 = vpop.f32.mrb[27].mxu0 }
 0x420   :  { %v1051_v43 = vmax.f32 %v1049_v26, %v1040_v41  ;;  %v1342_v46 = vpop.f32.mrb[29].mxu1  ;;  %v2991_v26 = vpop.eup %2275 }
 0x421   :  { %v1054_v49 = vsub.f32 %v2108_v19, %v1052_v39  ;;  %v1060_v50 = vsub.f32 %v2115_v20, %v1052_v39  ;;  %v1066_v53 = vsub.f32 %v2122_v38, %v1052_v39  ;;  %v2999_v32 = vpop.eup %2277 }
 0x422   :  { %v1053_v55 = vsub.f32 %v874_v23, %v1051_v43  ;;  %v1059_v56 = vsub.f32 %v957_v24, %v1051_v43  ;;  %v1065_v57 = vsub.f32 %v1040_v41, %v1051_v43  ;;  %v2136_v58 = vpop.f32.mrb[28].mxu0 }
 0x423   :  { %v1057_v59 = vmul.f32 1.442695, %v1054_v49  ;;  %v1063_v60 = vmul.f32 1.442695, %v1060_v50  ;;  %v1069_v61 = vmul.f32 1.442695, %v1066_v53  ;;  %v1352_v62 = vmax.f32 %v2129_v31, %v2136_v58 }
 0x424   :  { %v1055_v63 = vmul.f32 1.442695, %v1053_v55  ;;  %v1061_v3 = vmul.f32 1.442695, %v1059_v56  ;;  %v2157_v44 = vpop.f32.mrb[30].mxu1  ;;  %v1259_v4 = vpop.f32.mrb[29].mxu0 }
 0x425   :  { %2281 = vpow2.f32 %v1057_v59  ;;  %v1354_v45 = vmax.f32 %v1352_v62, %v2143_v40  ;;  %v1067_v6 = vmul.f32 1.442695, %v1065_v57  ;;  %v1351_v7 = vmax.f32 %v2975_v33, %v1259_v4  ;;  %v1561_v8 = vpop.f32.mrb[31].mxu1 }
 0x426   :  { %2283 = vpow2.f32 %v1063_v60  ;;  %v2150_v9 = vpop.f32.mrb[30].mxu0 }
 0x427   :  { %2285 = vpow2.f32 %v1069_v61  ;;  %v1356_v10 = vsub.f32 %v2129_v31, %v1354_v45  ;;  %v1362_v11 = vsub.f32 %v2136_v58, %v1354_v45  ;;  %v1368_v12 = vsub.f32 %v2143_v40, %v1354_v45  ;;  %v1478_v30 = vpop.f32.mrb[31].mxu0  ;;  %v3001_v40 = vpop.eup %2279 }
 0x428   :  { %2287 = vpow2.f32 %v1055_v63  ;;  %v1353_v14 = vmax.f32 %v1351_v7, %v1342_v46  ;;  %v1654_v16 = vmax.f32 %v2150_v9, %v2157_v44  ;;  %v1653_v17 = vmax.f32 %v1478_v30, %v1561_v8 }
 0x429   :  { %2289 = vpow2.f32 %v1061_v3  ;;  %v1359_v35 = vmul.f32 1.442695, %v1356_v10  ;;  %v1365_v19 = vmul.f32 1.442695, %v1362_v11  ;;  %v1371_v20 = vmul.f32 1.442695, %v1368_v12 }
 0x42a   :  { %2291 = vpow2.f32 %v1067_v6  ;;  %v1355_v22 = vsub.f32 %v2975_v33, %v1353_v14  ;;  %v1361_v23 = vsub.f32 %v1259_v4, %v1353_v14  ;;  %v1367_v24 = vsub.f32 %v1342_v46, %v1353_v14  ;;  %v2164_v25 = vpop.f32.mrb[32].mxu0 }
 0x42b   :  { %2293 = vpow2.f32 %v1359_v35  ;;  %v1656_v29 = vmax.f32 %v1654_v16, %v2164_v25  ;;  %v1644_v31 = vpop.f32.mrb[33].mxu0 }
 0x42c   :  { %2295 = vpow2.f32 %v1365_v19  ;;  %v1357_v34 = vmul.f32 1.442695, %v1355_v22  ;;  %v1363_v36 = vmul.f32 1.442695, %v1361_v23  ;;  %v1369_v33 = vmul.f32 1.442695, %v1367_v24 }
 0x42d   :  { %2297 = vpow2.f32 %v1371_v20  ;;  %v1658_v37 = vsub.f32 %v2150_v9, %v1656_v29  ;;  %v1664_v38 = vsub.f32 %v2157_v44, %v1656_v29  ;;  %v1670_v39 = vsub.f32 %v2164_v25, %v1656_v29 }
 0x42e   :  { %2299 = vpow2.f32 %v1357_v34  ;;  %v1655_v41 = vmax.f32 %v1653_v17, %v1644_v31  ;;  %v1095_v9 = vadd.f32 1.0, %v2984_v13  ;;  %v1398_v24 = vadd.f32 1.0, %v2988_v21 }
 0x42f   :  { %v2282_v42 = vpop.eup %2281  ;;  %2301 = vpow2.f32 %v1363_v36  ;;  %v1661_v43 = vmul.f32 1.442695, %v1658_v37  ;;  %v1667_v46 = vmul.f32 1.442695, %v1664_v38  ;;  %v1673_v49 = vmul.f32 1.442695, %v1670_v39 }
 0x430   :  { %v2284_v50 = vpop.eup %2283  ;;  %v1078_v53 = vmul.f32 %v2282_v42, %v2981_v5  ;;  %2303 = vpow2.f32 %v1369_v33  ;;  %v1657_v55 = vsub.f32 %v1478_v30, %v1655_v41  ;;  %v1663_v56 = vsub.f32 %v1561_v8, %v1655_v41 }
 0x431   :  { %v2286_v57 = vpop.eup %2285  ;;  %v1072_v58 = vadd.f32 %v2284_v50, %v2282_v42  ;;  %v1080_v51 = vmul.f32 %v2284_v50, %v3004_v47  ;;  %2305 = vpow2.f32 %v1661_v43  ;;  %v1669_v52 = vsub.f32 %v1644_v31, %v1655_v41 }
 0x432   :  { %v2288_v54 = vpop.eup %2287  ;;  %v1084_v59 = vmul.f32 %v2286_v57, %v3007_v48  ;;  %2307 = vpow2.f32 %v1667_v46  ;;  %v1659_v60 = vmul.f32 1.442695, %v1657_v55  ;;  %v1665_v61 = vmul.f32 1.442695, %v1663_v56 }
 0x433   :  { %v2290_v62 = vpop.eup %2289  ;;  %v1074_v63 = vadd.f32 %v2286_v57, %v1072_v58  ;;  %v1082_v3 = vadd.f32 %v1080_v51, %v1078_v53  ;;  %v1077_v45 = vmul.f32 %v2288_v54, %v2978_v2  ;;  %2309 = vpow2.f32 %v1673_v49 }
 0x434   :  { %v2292_v44 = vpop.eup %2291  ;;  %v1071_v4 = vadd.f32 %v2290_v62, %v2288_v54  ;;  %v1079_v6 = vmul.f32 %v2290_v62, %v2994_v27  ;;  %2311 = vpow2.f32 %v1659_v60  ;;  %v1671_v7 = vmul.f32 1.442695, %v1669_v52 }
 0x435   :  { %v2294_v8 = vpop.eup %2293  ;;  %2313 = vrcp.f32 %v1074_v63  ;;  %v1086_v10 = vadd.f32 %v1084_v59, %v1082_v3  ;;  %v1083_v11 = vmul.f32 %v2292_v44, %v2997_v28  ;;  %v1397_v42 = vadd.f32 1.0, %v2986_v18 }
 0x436   :  { %v2296_v12 = vpop.eup %2295  ;;  %v1073_v30 = vadd.f32 %v2292_v44, %v1071_v4  ;;  %v1081_v14 = vadd.f32 %v1079_v6, %v1077_v45  ;;  %v1380_v16 = vmul.f32 %v2294_v8, %v2981_v5  ;;  %2315 = vpow2.f32 %v1665_v61 }
 0x437   :  { %v2298_v17 = vpop.eup %2297  ;;  %v1374_v35 = vadd.f32 %v2296_v12, %v2294_v8  ;;  %v1382_v19 = vmul.f32 %v2296_v12, %v3004_v47  ;;  %2317 = vpow2.f32 %v1671_v7  ;;  %v1700_v51 = vadd.f32 1.0, %v2999_v32 }
 0x438   :  { %v2300_v20 = vpop.eup %2299  ;;  %2319 = vrcp.f32 %v1073_v30  ;;  %v1085_v22 = vadd.f32 %v1083_v11, %v1081_v14  ;;  %v1386_v13 = vmul.f32 %v2298_v17, %v3007_v48  ;;  %v1699_v3 = vadd.f32 1.0, %v2991_v26 }
 0x439   :  { %v2302_v23 = vpop.eup %2301  ;;  %v1376_v25 = vadd.f32 %v2298_v17, %v1374_v35  ;;  %v1384_v29 = vadd.f32 %v1382_v19, %v1380_v16  ;;  %v1379_v31 = vmul.f32 %v2300_v20, %v2978_v2  ;;  %2321 = vrcp.f32 %v1095_v9 }
 0x43a   :  { %v2304_v34 = vpop.eup %2303  ;;  %v1373_v36 = vadd.f32 %v2302_v23, %v2300_v20  ;;  %v1381_v33 = vmul.f32 %v2302_v23, %v2994_v27 }
 0x43b   :  { %v2306_v37 = vpop.eup %2305  ;;  %2323 = vrcp.f32 %v1376_v25  ;;  %v1388_v38 = vadd.f32 %v1386_v13, %v1384_v29  ;;  %v1385_v39 = vmul.f32 %v2304_v34, %v2997_v28 }
 0x43c   :  { %v2308_v41 = vpop.eup %2307  ;;  %v1375_v43 = vadd.f32 %v2304_v34, %v1373_v36  ;;  %v1383_v46 = vadd.f32 %v1381_v33, %v1379_v31  ;;  %v1682_v21 = vmul.f32 %v2306_v37, %v2981_v5  ;;  %2325 = vrcp.f32 %v1398_v24 }
 0x43d   :  { %v2310_v49 = vpop.eup %2309  ;;  %v1676_v50 = vadd.f32 %v2308_v41, %v2306_v37  ;;  %v1684_v53 = vmul.f32 %v2308_v41, %v3004_v47 }
 0x43e   :  { %v2312_v55 = vpop.eup %2311  ;;  %2327 = vrcp.f32 %v1375_v43  ;;  %v1387_v56 = vadd.f32 %v1385_v39, %v1383_v46  ;;  %v1688_v57 = vmul.f32 %v2310_v49, %v3007_v48  ;;  %v1963_v46 = vld [vmem:[%s3083_s16] ss:$0 sm:$0xff]  ;;  %s2537_s16 = scalar_lea.vmem %s1893_s26, 256 }
 0x43f   :  { %v2314_v58 = vpop.eup %2313  ;;  %v1678_v52 = vadd.f32 %v2310_v49, %v1676_v50  ;;  %v1686_v54 = vadd.f32 %v1684_v53, %v1682_v21  ;;  %v1681_v18 = vmul.f32 %v2312_v55, %v2978_v2  ;;  %2329 = vrcp.f32 %v1397_v42  ;;  %p2538_p2 = scmp.ne.s32.totalorder %s1893_s26, %s2537_s16  ;;  %p2543_p4 = scmp.lt.s32.totalorder %s2537_s16, %s2537_s16 }
 0x440   :  { %v2316_v59 = vpop.eup %2315  ;;  %v1088_v5 = vmul.f32 %v2314_v58, %v1086_v10 }
 0x441   :  { %v2318_v60 = vpop.eup %2317  ;;  %2331 = vrcp.f32 %v1678_v52  ;;  %v1690_v61 = vadd.f32 %v1688_v57, %v1686_v54  ;;  %v1675_v62 = vadd.f32 %v2316_v59, %v2312_v55  ;;  %v1683_v47 = vmul.f32 %v2316_v59, %v2994_v27  ;;  %p2544_p5 = por %p2543_p4, %p2542_p3 }
 0x442   :  { %v2320_v63 = vpop.eup %2319  ;;  %v1687_v48 = vmul.f32 %v2318_v60, %v2997_v28  ;;  %v1100_v32 = vmul.f32 %v3001_v40, %v1088_v5  ;;  %2333 = vrcp.f32 %v1700_v51  ;;  %v2262_v28 = vld [vmem:[%s3082_s15] sm:$0x3f]  }
 0x443   :  { %v1677_v45 = vadd.f32 %v2318_v60, %v1675_v62  ;;  %v1685_v44 = vadd.f32 %v1683_v47, %v1681_v18  ;;  %v1087_v2 = vmul.f32 %v2320_v63, %v1085_v22  ;;  %v2322_v4 = vpop.eup %2321  ;;  %v1825_v19 = vsel %vm236_vm1, %v2262_v28, 0  ;;  %p2545_p6 = pnand %p2544_p5, %p2538_p2 }
 0x445   :  { %v2324_v6 = vpop.eup %2323  ;;  %2335 = vrcp.f32 %v1677_v45  ;;  %v1689_v7 = vadd.f32 %v1687_v48, %v1685_v44  ;;  %v1099_v8 = vmul.f32 %v2322_v4, %v1087_v2 }
 0x446   :  { %v1390_v9 = vmul.f32 %v2324_v6, %v1388_v38  ;;  %v2326_v10 = vpop.eup %2325  ;;  %2337 = vrcp.f32 %v1699_v3 }
 0x447   :  { %v1101_v27 = vpack.c.bf16 %v1100_v32, %v1099_v8 }
 0x448   :  { %v2328_v11 = vpop.eup %2327  ;;  %v1402_v12 = vmul.f32 %v2326_v10, %v1390_v9 }
 0x449   :  { %2174 = vmatmul.mubr.msk.bf16.vlgmr.msra.gmra.mrb[36].mxu0 %vm232_vm3, %v1101_v27  ;;  %v1389_v26 = vmul.f32 %v2328_v11, %v1387_v56  ;;  %v2330_v40 = vpop.eup %2329 }
 0x44b   :  { %v2332_v30 = vpop.eup %2331  ;;  %v1401_v14 = vmul.f32 %v2330_v40, %v1389_v26 }
 0x44c   :  { %v1692_v16 = vmul.f32 %v2332_v30, %v1690_v61  ;;  %v2334_v17 = vpop.eup %2333 }
 0x44d   :  { %v1403_v35 = vpack.c.bf16 %v1402_v12, %v1401_v14 }
 0x44e   :  { %v1704_v20 = vmul.f32 %v2334_v17, %v1692_v16 }
 0x44f   :  { %v2336_v22 = vpop.eup %2335  ;;  %2168 = vmatmul.mubr.msk.bf16.vlgmr.msra.gmra.mrb[32].mxu1 %vm232_vm3, %v1403_v35 }
 0x450   :  { %2178 = vmatpush3.bf16.msra.mxu1 %v1825_v19  ;;  %2179 = vmatprep.mubr.msk.bf16.mxu1 %vm2585_vm2, %v2584_v15  ;;  %v1691_v13 = vmul.f32 %v2336_v22, %v1689_v7  ;;  %v2338_v23 = vpop.eup %2337  ;;  %v1880_v15 = vstv %s3091_s25 }
 0x451   :  { %v1881_v21 = vmul.f32 %v1880_v15, %v2791_v0  ;;  %v1882_v55 = vmul.f32 %v1880_v15, %v2793_v1 }
 0x452   :  { %v1703_v24 = vmul.f32 %v2338_v23, %v1691_v13 }
 0x454   :  { %v1705_v25 = vpack.c.bf16 %v1704_v20, %v1703_v24 }
 0x457   :  { %2180 = vmatmul.mubr.msk.bf16.vlgmr.msra.gmra.mrb[36].mxu1 %vm232_vm3, %v1705_v25 }
 0x51c   :  { %v1807_v29 = vpop.f32.mrb[36].mxu0 }
 0x51d   :  { %v2175_v31 = vpop.f32.mrb[37].mxu0 }
 0x51e   :  { %v1810_v34 = vpop.f32.mrb[38].mxu0 }
 0x51f   :  { %v2176_v36 = vpop.f32.mrb[39].mxu0 }
 0x522   :  { %v1755_v33 = vpop.f32.mrb[32].mxu1 }
 0x523   :  { %v1808_v37 = vadd.f32 %v1807_v29, %v1755_v33  ;;  %v2169_v38 = vpop.f32.mrb[33].mxu1 }
 0x524   :  { %v1758_v39 = vpop.f32.mrb[34].mxu1 }
 0x525   :  { %v1811_v41 = vadd.f32 %v1810_v34, %v1758_v39  ;;  %v2170_v42 = vpop.f32.mrb[35].mxu1 }
 0x52a   :  { %v1861_v43 = vpop.f32.mrb[36].mxu1 }
 0x52b   :  { %v1868_v49 = vadd.f32 %v1861_v43, %v1808_v37  ;;  %v2181_v50 = vpop.f32.mrb[37].mxu1 }
 0x52c   :  { %v1864_v53 = vpop.f32.mrb[38].mxu1 }
 0x52d   :  { %v1877_v56 = vadd.f32 %v1963_v46, %v1868_v49  ;;  %v1869_v57 = vadd.f32 %v1864_v53, %v1811_v41  ;;  %v2182_v58 = vpop.f32.mrb[39].mxu1 }
 0x52f   :  { %v1883_v51 = vadd.f32 %v1881_v21, %v1877_v56  ;;  %v1878_v52 = vadd.f32 %v1963_v46, %v1869_v57 }
 0x531   :  { %1885 = vst.msk [vmem:[#allocation18] sm:$0xff] %vm171_vm0, %v1883_v51  ;;  %v1884_v54 = vadd.f32 %v1882_v55, %v1878_v52 }
 0x533   :  { %1886 = vst.msk [vmem:[#allocation18 + $0x8] sm:$0xff] %vm171_vm0, %v1884_v54 }
 0x534   :  { %2548 = shalt.err (!%p2545_p6)
}
 0x535   :  { %s2549_s8 = scalar_lea.hbm %s3084_s17, 256 }
 0x536   :  { %p2550_p7 = scmp.ne.s32.totalorder %s3084_s17, %s2549_s8  ;;  %p2553_p8 = scmp.lt.u32.totalorder %s2549_s8, %s3084_s17 }
 0x538   :  { %p2555_p9 = pnand %p2553_p8, %p2550_p7 }
 0x53a   :  { %2558 = shalt.err (!%p2555_p9)
}
 0x53b   :  { %1898 = dma.vmem_to_hbm [thread:$0]  %s1893_s26, 256, %s3084_s17, [#allocation5], %s2576_s9, %s2576_s9, %s2577_s23  }
 0x53c   :  { %2569 = dma.done.wait [#allocation5], 256  }
 0x53d   :  { %2570 = vsyncadd [#allocation5], 4294967040 }
 0x53e   :  { %1902 = vsyncpa [#allocation4], 1 }
 0x53f   :  { %1903 = vsyncpa [#allocation7], 1 }
 0x540   :  { %1904 = vsyncpa [#allocation10], 1 }
 0x541   :  { %1905 = vsyncpa [#allocation13], 1 }
 0x542   :  { %1906 = vsyncpa [#allocation16], 1 }
 0x543   :  { %1907 = vsyncpa [#allocation5], 1 }

</bundles_post_ra>
